<compile_context>
chip_gen: v7x
topology: tpu7x:2x2x1
jax: 0.10.0
libtpu: 0.0.40
codegen_flags: <defaults>
</compile_context>

<pallas_src>
import jax
import jax.numpy as jnp
from jax.experimental import pallas as pl
from jax.experimental.pallas import tpu as pltpu


_VMEM_BUDGET = 48 * 1024 * 1024   # stay safely under v7x's 64 MiB VMEM (v5e/v6e have 128 MiB)


def _round_up(x, m):
    return ((x + m - 1) // m) * m


def _choose_tm(m, row_bytes, budget=_VMEM_BUDGET // 3, max_tm=1024):
    # rows per grid step: double-buffered tiles must stay well inside the VMEM budget.
    tm = max(8, min(max_tm, budget // max(1, 2 * row_bytes)))
    tm = min(tm, _round_up(m, 8))
    return max(8, (tm // 8) * 8)


def _pad_rows(a, m_pad):
    m = a.shape[0]
    if m_pad == m:
        return a
    return jnp.pad(a, ((0, m_pad - m),) + ((0, 0),) * (a.ndim - 1))


# ---------------- Pallas kernels ------------------------------------------------------

def _down_kernel(p_ref, w_ref, o_ref):
    # stride-2 4x4 conv as im2col GEMM (LeakyReLU already applied pre-im2col) + fused ReLU
    acc = jnp.dot(p_ref[...], w_ref[...], preferred_element_type=jnp.float32)
    o_ref[...] = jnp.maximum(acc, 0.0).astype(o_ref.dtype)


def _up_kernel(p_ref, w_ref, y_ref, s_ref):
    # one output-parity phase of the ConvTranspose as a GEMM; also emit per-tile BN partial sums
    acc = jnp.dot(p_ref[...], w_ref[...], preferred_element_type=jnp.float32)
    y_ref[...] = acc
    s_ref[0:1, :] = jnp.sum(acc, axis=0, keepdims=True)
    s_ref[1:2, :] = jnp.sum(acc * acc, axis=0, keepdims=True)


def _bn_cat_kernel(y_ref, x_ref, sc_ref, sh_ref, o_ref):
    # BatchNorm apply (precomputed scale/shift) + concat([bn(y), x]) via slice stores
    c = y_ref.shape[-1]
    yn = y_ref[...] * sc_ref[...] + sh_ref[...]
    o_ref[:, :c] = yn.astype(o_ref.dtype)
    o_ref[:, c:] = x_ref[...].astype(o_ref.dtype)


# ---------------- tiled pallas_call wrappers ------------------------------------------

def _down_conv_gemm(patches, wmat, out_dtype):
    m, k = patches.shape
    cout = wmat.shape[1]
    db = jnp.dtype(patches.dtype).itemsize
    tm = _choose_tm(m, k * db + cout * 4)
    m_pad = _round_up(m, tm)
    p = _pad_rows(patches, m_pad)
    out = pl.pallas_call(
        _down_kernel,
        out_shape=jax.ShapeDtypeStruct((m_pad, cout), out_dtype),
        grid=(m_pad // tm,),
        in_specs=[
            pl.BlockSpec((tm, k), lambda i: (i, 0)),
            pl.BlockSpec((k, cout), lambda i: (0, 0)),
        ],
        out_specs=pl.BlockSpec((tm, cout), lambda i: (i, 0)),
        compiler_params=pltpu.CompilerParams(
            dimension_semantics=("parallel",),
            vmem_limit_bytes=_VMEM_BUDGET,
        ),
    )(p, wmat)
    return out[:m]


def _up_conv_gemm(patches, wmats):
    # patches: (4, M, K) phase-stacked, wmats: (4, K, Cout)
    nph, m, k = patches.shape
    cout = wmats.shape[2]
    db = jnp.dtype(patches.dtype).itemsize
    tm = _choose_tm(m, k * db + cout * 4)
    m_pad = _round_up(m, tm)
    if m_pad != m:
        patches = jnp.pad(patches, ((0, 0), (0, m_pad - m), (0, 0)))
    nt = m_pad // tm
    y, stats = pl.pallas_call(
        _up_kernel,
        out_shape=(
            jax.ShapeDtypeStruct((nph, m_pad, cout), jnp.float32),
            jax.ShapeDtypeStruct((nph, nt, 2, cout), jnp.float32),
        ),
        grid=(nph, nt),
        in_specs=[
            pl.BlockSpec((None, tm, k), lambda p, i: (p, i, 0)),
            pl.BlockSpec((None, k, cout), lambda p, i: (p, 0, 0)),
        ],
        out_specs=(
            pl.BlockSpec((None, tm, cout), lambda p, i: (p, i, 0)),
            pl.BlockSpec((None, None, 2, cout), lambda p, i: (p, i, 0, 0)),
        ),
        compiler_params=pltpu.CompilerParams(
            dimension_semantics=("parallel", "parallel"),
            vmem_limit_bytes=_VMEM_BUDGET,
        ),
    )(patches, wmats)
    return y[:, :m, :], stats


def _bn_cat(y_flat, x_flat, scale, shift):
    m, c = y_flat.shape
    tm = _choose_tm(m, 4 * c * 4)
    m_pad = _round_up(m, tm)
    y_p = _pad_rows(y_flat, m_pad)
    x_p = _pad_rows(x_flat, m_pad)
    out = pl.pallas_call(
        _bn_cat_kernel,
        out_shape=jax.ShapeDtypeStruct((m_pad, 2 * c), jnp.float32),
        grid=(m_pad // tm,),
        in_specs=[
            pl.BlockSpec((tm, c), lambda i: (i, 0)),
            pl.BlockSpec((tm, c), lambda i: (i, 0)),
            pl.BlockSpec((1, c), lambda i: (0, 0)),
            pl.BlockSpec((1, c), lambda i: (0, 0)),
        ],
        out_specs=pl.BlockSpec((tm, 2 * c), lambda i: (i, 0)),
        compiler_params=pltpu.CompilerParams(
            dimension_semantics=("parallel",),
            vmem_limit_bytes=_VMEM_BUDGET,
        ),
    )(y_p, x_p, scale, shift)
    return out[:m]


# ---------------- glue: im2col / weight prep (pure rearrangement) ---------------------

def _im2col(xp, k, stride):
    # xp: (N, Hp, Wp, C) -> (N*Ho*Wo, C*k*k), column order: c-major, then (kh*k + kw)
    n, hp, wp, c = xp.shape
    ho = (hp - k) // stride + 1
    wo = (wp - k) // stride + 1
    cols = []
    for i in range(k):
        for j in range(k):
            cols.append(xp[:, i:i + stride * ho:stride, j:j + stride * wo:stride, :])
    patches = jnp.stack(cols, axis=3)                  # (N, Ho, Wo, k*k, C)
    patches = jnp.transpose(patches, (0, 1, 2, 4, 3))  # (N, Ho, Wo, C, k*k)
    return patches.reshape(n * ho * wo, c * k * k), ho, wo


def _convt_phase_weights(w_up):
    # w_up: (Cin, Cout, 4, 4) PyTorch ConvTranspose2d layout.
    # Phase (ph, pw) = parity of the output pixel; each phase sees a 2x2 input neighborhood
    # hitting kernel taps {3,1} (even) or {2,0} (odd) along each axis.
    cin, cout = w_up.shape[0], w_up.shape[1]
    taps = ((3, 1), (2, 0))
    mats = []
    for ph in range(2):
        for pw in range(2):
            kh, kw = taps[ph], taps[pw]
            # column order matches the 2x2 im2col: c-major, then (a*2 + b)
            cols = [w_up[:, :, kh[a], kw[b]] for a in range(2) for b in range(2)]
            wm = jnp.stack(cols, axis=1).reshape(cin * 4, cout)
            mats.append(wm)
    return jnp.stack(mats, axis=0)                     # (4, Cin*4, Cout), phase = ph*2 + pw


def prepare_params(params, compute_dtype=jnp.bfloat16):
    # Precompute GEMM weight matrices once, outside the jitted forward.
    w_down = jnp.asarray(params["w_down"], jnp.float32)   # (inner, outer, 4, 4)  Conv2d OIHW
    w_up = jnp.asarray(params["w_up"], jnp.float32)       # (inner, outer, 4, 4)  ConvT (in,out,kh,kw)
    inner_nc, outer_nc = w_down.shape[0], w_down.shape[1]
    wmat_d = jnp.transpose(w_down, (1, 2, 3, 0)).reshape(outer_nc * 16, inner_nc)
    wmat_up = _convt_phase_weights(w_up)                   # (4, inner*4, outer)
    return {
        "wmat_d": wmat_d.astype(compute_dtype),
        "wmat_up": wmat_up.astype(compute_dtype),
        "gamma": jnp.asarray(params["gamma"], jnp.float32),
        "beta": jnp.asarray(params["beta"], jnp.float32),
    }


# ---------------- forward --------------------------------------------------------------

def unet_innermost_forward(x_nchw, prep):
    wmat_d = prep["wmat_d"]            # (outer*16, inner), compute dtype
    wmat_up = prep["wmat_up"]          # (4, inner*4, outer), compute dtype
    gamma, beta = prep["gamma"], prep["beta"]
    cdtype = wmat_d.dtype
    outer_nc = wmat_d.shape[0] // 16
    inner_nc = wmat_d.shape[1]

    n, c_in, h, w = x_nchw.shape
    assert c_in == outer_nc
    x = jnp.transpose(x_nchw, (0, 2, 3, 1)).astype(jnp.float32)   # NHWC (f32 skip path)

    # ---- down: LeakyReLU(0.2) on the un-expanded input, then Conv2d(k4,s2,p1) as tiled GEMM ----
    a = jnp.where(x >= 0, x, 0.2 * x).astype(cdtype)
    ap = jnp.pad(a, ((0, 0), (1, 1), (1, 1), (0, 0)))             # leaky_relu(0)==0, pad-safe
    patches_d, ho, wo = _im2col(ap, 4, 2)                         # (N*Ho*Wo, outer*16)
    hmat = _down_conv_gemm(patches_d, wmat_d, cdtype)             # fused ReLU, (N*Ho*Wo, inner)

    # ---- up: ConvTranspose2d(k4,s2,p1) as 4 output-parity phase GEMMs (no zero-stuffing) ----
    h_img = hmat.reshape(n, ho, wo, inner_nc)
    h_pad = jnp.pad(h_img, ((0, 0), (1, 1), (1, 1), (0, 0)))      # relu(0)==0, pad-safe
    phase_patches = []
    for ph in range(2):
        for pw in range(2):
            view = h_pad[:, ph:ph + ho + 1, pw:pw + wo + 1, :]
            p, _, _ = _im2col(view, 2, 1)                         # (N*Ho*Wo, inner*4)
            phase_patches.append(p)
    patches_u = jnp.stack(phase_patches, axis=0)                  # (4, N*Ho*Wo, inner*4)
    y_ph, stats = _up_conv_gemm(patches_u, wmat_up)               # (4, M, outer), (4, T, 2, outer)

    # ---- BatchNorm2d (training-mode batch stats) from in-kernel partial sums ----
    m_total = n * (2 * ho) * (2 * wo)
    s = jnp.sum(stats, axis=(0, 1))                               # (2, outer)
    mean = s[0] / m_total
    var = s[1] / m_total - mean * mean
    scale = gamma * jax.lax.rsqrt(var + 1e-5)
    shift = beta - mean * scale

    # scatter phases back to image row order (pure data movement)
    y_img = y_ph.reshape(2, 2, n, ho, wo, outer_nc)
    y_img = jnp.transpose(y_img, (2, 3, 0, 4, 1, 5)).reshape(n, 2 * ho, 2 * wo, outer_nc)

    # ---- normalize + concat([bn(y), x], channel): row-tiled, slice stores ----
    y_flat = y_img.reshape(n * h * w, outer_nc)
    x_flat = x.reshape(n * h * w, outer_nc)
    out_flat = _bn_cat(y_flat, x_flat, scale.reshape(1, -1), shift.reshape(1, -1))
    out = out_flat.reshape(n, h, w, 2 * outer_nc)
    return jnp.transpose(out, (0, 3, 1, 2))                       # back to NCHW


# ---------------- pure-JAX reference (for correctness check) ---------------------------

def _reference(x, params):
    w_down, w_up = params["w_down"], params["w_up"]
    gamma, beta = params["gamma"], params["beta"]
    a = jnp.where(x >= 0, x, 0.2 * x)
    hcv = jax.lax.conv_general_dilated(a, w_down, (2, 2), ((1, 1), (1, 1)),
                                       dimension_numbers=("NCHW", "OIHW", "NCHW"))
    r = jnp.maximum(hcv, 0.0)
    w_conv = jnp.transpose(w_up, (1, 0, 2, 3))[:, :, ::-1, ::-1]
    y = jax.lax.conv_general_dilated(r, w_conv, (1, 1), ((2, 2), (2, 2)),
                                     lhs_dilation=(2, 2),
                                     dimension_numbers=("NCHW", "OIHW", "NCHW"))
    mean = jnp.mean(y, axis=(0, 2, 3), keepdims=True)
    var = jnp.mean((y - mean) ** 2, axis=(0, 2, 3), keepdims=True)
    yn = (y - mean) / jnp.sqrt(var + 1e-5)
    yn = yn * gamma.reshape(1, -1, 1, 1) + beta.reshape(1, -1, 1, 1)
    return jnp.concatenate([yn, x], axis=1)


if __name__ == "__main__":
    key = jax.random.PRNGKey(0)
    k1, k2, k3, k4, k5 = jax.random.split(key, 5)

    N, OUTER_NC, INNER_NC, H, W = 2, 4, 8, 16, 16

    x = jax.random.normal(k1, (N, OUTER_NC, H, W), jnp.float32)
    params = {
        # deterministic synthetic weights (shapes follow nn.Conv2d / nn.ConvTranspose2d)
        "w_down": 0.1 * jax.random.normal(k2, (INNER_NC, OUTER_NC, 4, 4), jnp.float32),
        "w_up":   0.1 * jax.random.normal(k3, (INNER_NC, OUTER_NC, 4, 4), jnp.float32),
        "gamma":  1.0 + 0.1 * jax.random.normal(k4, (OUTER_NC,), jnp.float32),
        "beta":   0.1 * jax.random.normal(k5, (OUTER_NC,), jnp.float32),
    }

    ref = _reference(x, params)
    fwd = jax.jit(unet_innermost_forward)

    # f32 compute path: tight numerical check against the XLA reference.
    prep_f32 = prepare_params(params, compute_dtype=jnp.float32)
    out_f32 = jax.block_until_ready(fwd(x, prep_f32))
    assert out_f32.shape == (N, 2 * OUTER_NC, H, W), out_f32.shape
    err32 = float(jnp.max(jnp.abs(out_f32 - ref)))
    assert jnp.allclose(out_f32, ref, atol=2e-3, rtol=2e-3), f"f32 max abs err {err32}"

    # bf16-in / f32-accumulate perf path (default): looser sanity tolerance.
    prep_bf16 = prepare_params(params, compute_dtype=jnp.bfloat16)
    out_bf16 = jax.block_until_ready(fwd(x, prep_bf16))
    assert out_bf16.shape == (N, 2 * OUTER_NC, H, W), out_bf16.shape
    errbf = float(jnp.max(jnp.abs(out_bf16 - ref)))
    assert jnp.allclose(out_bf16, ref, atol=1e-1, rtol=1e-1), f"bf16 max abs err {errbf}"

    print("KERNEL_OK")
</pallas_src>

<mosaic_0001>
module attributes {stable_mosaic.version = 11 : i64} {
  func.func @_down_kernel(%arg0: i32, %arg1: memref<128x64xf32, #tpu.memory_space<vmem>>, %arg2: memref<64x8xf32, #tpu.memory_space<vmem>>, %arg3: memref<128x8xf32, #tpu.memory_space<vmem>>) attributes {dimension_semantics = [#tpu.dimension_semantics<parallel>], iteration_bounds = array<i64: 1>, scalar_prefetch = 0 : i64, scratch_operands = 0 : i64, tpu.core_type = #tpu.core_type<tc>, window_params = [{transform_indices = @transform_0, window_bounds = array<i64: 128, 64>}, {pipeline_mode = #tpu.pipeline_mode<synchronous>, transform_indices = @transform_1, window_bounds = array<i64: 64, 8>}, {transform_indices = @transform_2, window_bounds = array<i64: 128, 8>}]} {
    %c0 = arith.constant 0 : index
    %c0_0 = arith.constant 0 : index
    %0 = vector.load %arg1[%c0, %c0_0] : memref<128x64xf32, #tpu.memory_space<vmem>>, vector<128x64xf32>
    %c0_1 = arith.constant 0 : index
    %c0_2 = arith.constant 0 : index
    %1 = vector.load %arg2[%c0_1, %c0_2] : memref<64x8xf32, #tpu.memory_space<vmem>>, vector<64x8xf32>
    %cst = arith.constant dense<0.000000e+00> : vector<128x8xf32>
    %2 = tpu.matmul %0, %1, %cst {dimension_numbers = #tpu.dot_dimension_numbers<[1], [0], [0], [1], [0, 0, 1, 1], [], []>} : vector<128x64xf32>, vector<64x8xf32>, vector<128x8xf32> -> vector<128x8xf32>
    %cst_3 = arith.constant 0.000000e+00 : f32
    %3 = vector.broadcast %cst_3 : f32 to vector<128x8xf32>
    %4 = arith.maximumf %2, %3 : vector<128x8xf32>
    %c0_4 = arith.constant 0 : index
    %c0_5 = arith.constant 0 : index
    %5 = vector.load %arg3[%c0_4, %c0_5] : memref<128x8xf32, #tpu.memory_space<vmem>>, vector<128x8xf32>
    tpu.vector_store %arg3[%c0_4, %c0_5], %4 {strides = array<i32>} : memref<128x8xf32, #tpu.memory_space<vmem>>, vector<128x8xf32>,
    return
  }
  func.func @transform_0(%arg0: i32) -> (i32, i32) {
    %c0_i32 = arith.constant 0 : i32
    %c0_i32_0 = arith.constant 0 : i32
    return %arg0, %c0_i32 : i32, i32
  }
  func.func @transform_1(%arg0: i32) -> (i32, i32) {
    %c0_i32 = arith.constant 0 : i32
    %c0_i32_0 = arith.constant 0 : i32
    %c0_i32_1 = arith.constant 0 : i32
    return %c0_i32, %c0_i32_0 : i32, i32
  }
  func.func @transform_2(%arg0: i32) -> (i32, i32) {
    %c0_i32 = arith.constant 0 : i32
    %c0_i32_0 = arith.constant 0 : i32
    return %arg0, %c0_i32 : i32, i32
  }
}

module attributes {stable_mosaic.version = 11 : i64} {
  func.func @_up_kernel(%arg0: i32, %arg1: i32, %arg2: memref<1x128x32xf32, #tpu.memory_space<vmem>>, %arg3: memref<1x32x4xf32, #tpu.memory_space<vmem>>, %arg4: memref<1x128x4xf32, #tpu.memory_space<vmem>>, %arg5: memref<1x1x2x4xf32, #tpu.memory_space<vmem>>) attributes {dimension_semantics = [#tpu.dimension_semantics<parallel>, #tpu.dimension_semantics<parallel>], iteration_bounds = array<i64: 4, 1>, scalar_prefetch = 0 : i64, scratch_operands = 0 : i64, tpu.core_type = #tpu.core_type<tc>, window_params = [{transform_indices = @transform_0, window_bounds = array<i64: 1, 128, 32>}, {transform_indices = @transform_1, window_bounds = array<i64: 1, 32, 4>}, {transform_indices = @transform_2, window_bounds = array<i64: 1, 128, 4>}, {transform_indices = @transform_3, window_bounds = array<i64: 1, 1, 2, 4>}]} {
    %c0 = arith.constant 0 : index
    %c0_0 = arith.constant 0 : index
    %c0_1 = arith.constant 0 : index
    %0 = vector.load %arg2[%c0, %c0_0, %c0_1] : memref<1x128x32xf32, #tpu.memory_space<vmem>>, vector<1x128x32xf32>
    %1 = vector.shape_cast %0 : vector<1x128x32xf32> to vector<128x32xf32>
    %c0_2 = arith.constant 0 : index
    %c0_3 = arith.constant 0 : index
    %c0_4 = arith.constant 0 : index
    %2 = vector.load %arg3[%c0_2, %c0_3, %c0_4] : memref<1x32x4xf32, #tpu.memory_space<vmem>>, vector<1x32x4xf32>
    %3 = vector.shape_cast %2 : vector<1x32x4xf32> to vector<32x4xf32>
    %cst = arith.constant dense<0.000000e+00> : vector<128x4xf32>
    %4 = tpu.matmul %1, %3, %cst {dimension_numbers = #tpu.dot_dimension_numbers<[1], [0], [0], [1], [0, 0, 1, 1], [], []>} : vector<128x32xf32>, vector<32x4xf32>, vector<128x4xf32> -> vector<128x4xf32>
    %c0_5 = arith.constant 0 : index
    %c0_6 = arith.constant 0 : index
    %c0_7 = arith.constant 0 : index
    %5 = vector.load %arg4[%c0_5, %c0_6, %c0_7] : memref<1x128x4xf32, #tpu.memory_space<vmem>>, vector<1x128x4xf32>
    %6 = vector.shape_cast %5 : vector<1x128x4xf32> to vector<128x4xf32>
    %7 = vector.shape_cast %4 : vector<128x4xf32> to vector<1x128x4xf32>
    tpu.vector_store %arg4[%c0_5, %c0_6, %c0_7], %7 {strides = array<i32>} : memref<1x128x4xf32, #tpu.memory_space<vmem>>, vector<1x128x4xf32>,
    %cst_8 = arith.constant dense<0.000000e+00> : vector<4xf32>
    %8 = vector.multi_reduction <add>, %4, %cst_8 [0] : vector<128x4xf32> to vector<4xf32>
    %9 = vector.shape_cast %8 : vector<4xf32> to vector<1x4xf32>
    %c0_9 = arith.constant 0 : index
    %c0_10 = arith.constant 0 : index
    %c0_11 = arith.constant 0 : index
    %c0_12 = arith.constant 0 : index
    %10 = vector.load %arg5[%c0_9, %c0_10, %c0_11, %c0_12] : memref<1x1x2x4xf32, #tpu.memory_space<vmem>>, vector<1x1x1x4xf32>
    %11 = vector.shape_cast %10 : vector<1x1x1x4xf32> to vector<1x4xf32>
    %12 = vector.shape_cast %9 : vector<1x4xf32> to vector<1x1x1x4xf32>
    tpu.vector_store %arg5[%c0_9, %c0_10, %c0_11, %c0_12], %12 {strides = array<i32>} : memref<1x1x2x4xf32, #tpu.memory_space<vmem>>, vector<1x1x1x4xf32>,
    %13 = arith.mulf %4, %4 : vector<128x4xf32>
    %cst_13 = arith.constant dense<0.000000e+00> : vector<4xf32>
    %14 = vector.multi_reduction <add>, %13, %cst_13 [0] : vector<128x4xf32> to vector<4xf32>
    %15 = vector.shape_cast %14 : vector<4xf32> to vector<1x4xf32>
    %c0_14 = arith.constant 0 : index
    %c0_15 = arith.constant 0 : index
    %c1 = arith.constant 1 : index
    %c0_16 = arith.constant 0 : index
    %16 = vector.load %arg5[%c0_14, %c0_15, %c1, %c0_16] : memref<1x1x2x4xf32, #tpu.memory_space<vmem>>, vector<1x1x1x4xf32>
    %17 = vector.shape_cast %16 : vector<1x1x1x4xf32> to vector<1x4xf32>
    %18 = vector.shape_cast %15 : vector<1x4xf32> to vector<1x1x1x4xf32>
    tpu.vector_store %arg5[%c0_14, %c0_15, %c1, %c0_16], %18 {strides = array<i32>} : memref<1x1x2x4xf32, #tpu.memory_space<vmem>>, vector<1x1x1x4xf32>,
    return
  }
  func.func @transform_0(%arg0: i32, %arg1: i32) -> (i32, i32, i32) {
    %c0_i32 = arith.constant 0 : i32
    %c0_i32_0 = arith.constant 0 : i32
    return %arg0, %arg1, %c0_i32 : i32, i32, i32
  }
  func.func @transform_1(%arg0: i32, %arg1: i32) -> (i32, i32, i32) {
    %c0_i32 = arith.constant 0 : i32
    %c0_i32_0 = arith.constant 0 : i32
    %c0_i32_1 = arith.constant 0 : i32
    return %arg0, %c0_i32, %c0_i32_0 : i32, i32, i32
  }
  func.func @transform_2(%arg0: i32, %arg1: i32) -> (i32, i32, i32) {
    %c0_i32 = arith.constant 0 : i32
    %c0_i32_0 = arith.constant 0 : i32
    return %arg0, %arg1, %c0_i32 : i32, i32, i32
  }
  func.func @transform_3(%arg0: i32, %arg1: i32) -> (i32, i32, i32, i32) {
    %c0_i32 = arith.constant 0 : i32
    %c0_i32_0 = arith.constant 0 : i32
    %c0_i32_1 = arith.constant 0 : i32
    return %arg0, %arg1, %c0_i32, %c0_i32_0 : i32, i32, i32, i32
  }
}

module attributes {stable_mosaic.version = 11 : i64} {
  func.func @_bn_cat_kernel(%arg0: i32, %arg1: memref<512x4xf32, #tpu.memory_space<vmem>>, %arg2: memref<512x4xf32, #tpu.memory_space<vmem>>, %arg3: memref<1x4xf32, #tpu.memory_space<vmem>>, %arg4: memref<1x4xf32, #tpu.memory_space<vmem>>, %arg5: memref<512x8xf32, #tpu.memory_space<vmem>>) attributes {dimension_semantics = [#tpu.dimension_semantics<parallel>], iteration_bounds = array<i64: 1>, scalar_prefetch = 0 : i64, scratch_operands = 0 : i64, tpu.core_type = #tpu.core_type<tc>, window_params = [{transform_indices = @transform_0, window_bounds = array<i64: 512, 4>}, {transform_indices = @transform_1, window_bounds = array<i64: 512, 4>}, {pipeline_mode = #tpu.pipeline_mode<synchronous>, transform_indices = @transform_2, window_bounds = array<i64: 1, 4>}, {pipeline_mode = #tpu.pipeline_mode<synchronous>, transform_indices = @transform_3, window_bounds = array<i64: 1, 4>}, {transform_indices = @transform_4, window_bounds = array<i64: 512, 8>}]} {
    %c0 = arith.constant 0 : index
    %c0_0 = arith.constant 0 : index
    %0 = vector.load %arg1[%c0, %c0_0] : memref<512x4xf32, #tpu.memory_space<vmem>>, vector<512x4xf32>
    %c0_1 = arith.constant 0 : index
    %c0_2 = arith.constant 0 : index
    %1 = vector.load %arg3[%c0_1, %c0_2] : memref<1x4xf32, #tpu.memory_space<vmem>>, vector<1x4xf32>
    %2 = vector.broadcast %1 : vector<1x4xf32> to vector<512x4xf32>
    %3 = arith.mulf %0, %2 : vector<512x4xf32>
    %c0_3 = arith.constant 0 : index
    %c0_4 = arith.constant 0 : index
    %4 = vector.load %arg4[%c0_3, %c0_4] : memref<1x4xf32, #tpu.memory_space<vmem>>, vector<1x4xf32>
    %5 = vector.broadcast %4 : vector<1x4xf32> to vector<512x4xf32>
    %6 = arith.addf %3, %5 : vector<512x4xf32>
    %c0_5 = arith.constant 0 : index
    %c0_6 = arith.constant 0 : index
    %7 = vector.load %arg5[%c0_5, %c0_6] : memref<512x8xf32, #tpu.memory_space<vmem>>, vector<512x4xf32>
    tpu.vector_store %arg5[%c0_5, %c0_6], %6 {strides = array<i32>} : memref<512x8xf32, #tpu.memory_space<vmem>>, vector<512x4xf32>,
    %c0_7 = arith.constant 0 : index
    %c0_8 = arith.constant 0 : index
    %8 = vector.load %arg2[%c0_7, %c0_8] : memref<512x4xf32, #tpu.memory_space<vmem>>, vector<512x4xf32>
    %c0_9 = arith.constant 0 : index
    %c4 = arith.constant 4 : index
    %9 = vector.load %arg5[%c0_9, %c4] : memref<512x8xf32, #tpu.memory_space<vmem>>, vector<512x4xf32>
    tpu.vector_store %arg5[%c0_9, %c4], %8 {strides = array<i32>} : memref<512x8xf32, #tpu.memory_space<vmem>>, vector<512x4xf32>,
    return
  }
  func.func @transform_0(%arg0: i32) -> (i32, i32) {
    %c0_i32 = arith.constant 0 : i32
    %c0_i32_0 = arith.constant 0 : i32
    return %arg0, %c0_i32 : i32, i32
  }
  func.func @transform_1(%arg0: i32) -> (i32, i32) {
    %c0_i32 = arith.constant 0 : i32
    %c0_i32_0 = arith.constant 0 : i32
    return %arg0, %c0_i32 : i32, i32
  }
  func.func @transform_2(%arg0: i32) -> (i32, i32) {
    %c0_i32 = arith.constant 0 : i32
    %c0_i32_0 = arith.constant 0 : i32
    %c0_i32_1 = arith.constant 0 : i32
    return %c0_i32, %c0_i32_0 : i32, i32
  }
  func.func @transform_3(%arg0: i32) -> (i32, i32) {
    %c0_i32 = arith.constant 0 : i32
    %c0_i32_0 = arith.constant 0 : i32
    %c0_i32_1 = arith.constant 0 : i32
    return %c0_i32, %c0_i32_0 : i32, i32
  }
  func.func @transform_4(%arg0: i32) -> (i32, i32) {
    %c0_i32 = arith.constant 0 : i32
    %c0_i32_0 = arith.constant 0 : i32
    return %arg0, %c0_i32 : i32, i32
  }
}

</mosaic_0001>

<bundles_post_ra>
// kernel: unet_innermost_forward.3
= control target key start
LH: loop header
LB: loop body
LE: loop exit
PB: predicated region body
PF: predicated region fallthrough
CT: control target
= control target key end

     0   :  { %vm35_vm0 = vcmask 523264   ;;  %vm245_vm1 = vcmask 64512   ;;  %s537_s1 = inlined_call_operand.vmem [shape: f32[64,8], index: 1, kind: input, shape index: {}]   ;;  %s538_s0 = inlined_call_operand.vmem [shape: f32[128,64], index: 0, kind: input, shape index: {}]   ;;  %s539_s2 = inlined_call_operand.vmem [shape: f32[128,8], index: 2, kind: output, shape index: {}]  }
   0x1   :  { %v27_v0 = vld [vmem:[%s537_s1] sm:$0xff]  ;;  %v28_v1 = vld [vmem:[%s537_s1 + $0x8] sm:$0xff]  ;;  %v29_v2 = vld [vmem:[%s537_s1 + $0x10] sm:$0xff] }
   0x2   :  { %v346_v3 = vpack.c.bf16 %v28_v1, %v27_v0  ;;  %v30_v4 = vld [vmem:[%s537_s1 + $0x18] sm:$0xff]  ;;  %v31_v6 = vld [vmem:[%s537_s1 + $0x20] sm:$0xff]  ;;  %v32_v7 = vld [vmem:[%s537_s1 + $0x28] sm:$0xff] }
   0x3   :  { %v350_v5 = vpack.c.bf16 %v30_v4, %v29_v2  ;;  %v11_v8 = vld [vmem:[%s538_s0] sm:$0xff]  ;;  %v354_v10 = vpack.c.bf16 %v32_v7, %v31_v6  ;;  %v33_v11 = vld [vmem:[%s537_s1 + $0x30] sm:$0xff]  ;;  %v34_v12 = vld [vmem:[%s537_s1 + $0x38] sm:$0xff] }
   0x4   :  { %347 = vmatprep.subr.bf16.mxu0 %v346_v3  ;;  %362 = vmatprep.subr.bf16.mxu1 %v346_v3  ;;  %v19_v9 = vld [vmem:[%s538_s0 + $0x40] sm:$0xff]  ;;  %v358_v13 = vpack.c.bf16 %v34_v12, %v33_v11  ;;  %v12_v14 = vld [vmem:[%s538_s0 + $0x8] sm:$0xff]  ;;  %v13_v16 = vld [vmem:[%s538_s0 + $0x10] sm:$0xff] }
   0x5   :  { %349 = vmatpush3.bf16.msra.mxu0 %v346_v3  ;;  %366 = vmatpush3.bf16.msra.mxu1 %v346_v3  ;;  %v20_v15 = vld [vmem:[%s538_s0 + $0x48] sm:$0xff]  ;;  %v21_v17 = vld [vmem:[%s538_s0 + $0x50] sm:$0xff]  ;;  %v14_v18 = vld [vmem:[%s538_s0 + $0x18] sm:$0xff] }
   0x6   :  { %351 = vmatprep.subr.bf16.mxu0 %v350_v5  ;;  %363 = vmatprep.subr.bf16.mxu1 %v350_v5  ;;  %v22_v19 = vld [vmem:[%s538_s0 + $0x58] sm:$0xff]  ;;  %v15_v20 = vld [vmem:[%s538_s0 + $0x20] sm:$0xff]  ;;  %v16_v22 = vld [vmem:[%s538_s0 + $0x28] sm:$0xff] }
   0x7   :  { %322 = vmatprep.mubr.msk.f32.mxu0 %vm35_vm0, %v11_v8  ;;  %334 = vmatprep.mubr.msk.f32.mxu1 %vm35_vm0, %v19_v9  ;;  %v23_v21 = vld [vmem:[%s538_s0 + $0x60] sm:$0xff]  ;;  %v24_v23 = vld [vmem:[%s538_s0 + $0x68] sm:$0xff]  ;;  %v17_v24 = vld [vmem:[%s538_s0 + $0x30] sm:$0xff] }
   0x8   :  { %v25_v25 = vld [vmem:[%s538_s0 + $0x70] sm:$0xff]  ;;  %v18_v26 = vld [vmem:[%s538_s0 + $0x38] sm:$0xff] }
   0x9   :  { %353 = vmatpush3.bf16.msra.mxu0 %v350_v5  ;;  %367 = vmatpush3.bf16.msra.mxu1 %v350_v5  ;;  %v26_v27 = vld [vmem:[%s538_s0 + $0x78] sm:$0xff] }
   0xa   :  { %355 = vmatprep.subr.bf16.mxu0 %v354_v10  ;;  %364 = vmatprep.subr.bf16.mxu1 %v354_v10 }
   0xd   :  { %357 = vmatpush3.bf16.msra.mxu0 %v354_v10  ;;  %368 = vmatpush3.bf16.msra.mxu1 %v354_v10 }
   0xe   :  { %359 = vmatprep.subr.bf16.mxu0 %v358_v13  ;;  %365 = vmatprep.subr.bf16.mxu1 %v358_v13 }
  0x11   :  { %361 = vmatpush3.bf16.msra.mxu0 %v358_v13  ;;  %369 = vmatpush3.bf16.msra.mxu1 %v358_v13 }
  0x14   :  { %323 = vmatmul.mubr.msk.f32.vlgmr.msra.gmra.mrb[0].mxu0 %vm35_vm0, %v12_v14  ;;  %335 = vmatmul.mubr.msk.f32.vlgmr.msra.gmra.mrb[0].mxu1 %vm35_vm0, %v20_v15 }
  0x15   :  { %325 = vmatprep.mubr.msk.f32.mxu0 %vm35_vm0, %v13_v16  ;;  %337 = vmatprep.mubr.msk.f32.mxu1 %vm35_vm0, %v21_v17 }
  0x18   :  { %326 = vmatmul.mubr.msk.f32.gmra.mrb[2].mxu0 %vm35_vm0, %v14_v18  ;;  %338 = vmatmul.mubr.msk.f32.gmra.mrb[2].mxu1 %vm35_vm0, %v22_v19 }
  0x19   :  { %328 = vmatprep.mubr.msk.f32.mxu0 %vm35_vm0, %v15_v20  ;;  %340 = vmatprep.mubr.msk.f32.mxu1 %vm35_vm0, %v23_v21 }
  0x1c   :  { %329 = vmatmul.mubr.msk.f32.gmra.mrb[4].mxu0 %vm35_vm0, %v16_v22  ;;  %341 = vmatmul.mubr.msk.f32.gmra.mrb[4].mxu1 %vm35_vm0, %v24_v23 }
  0x1d   :  { %331 = vmatprep.mubr.msk.f32.mxu0 %vm35_vm0, %v17_v24  ;;  %343 = vmatprep.mubr.msk.f32.mxu1 %vm35_vm0, %v25_v25 }
  0x20   :  { %332 = vmatmul.mubr.msk.f32.gmra.mrb[6].mxu0 %vm35_vm0, %v18_v26  ;;  %344 = vmatmul.mubr.msk.f32.gmra.mrb[6].mxu1 %vm35_vm0, %v26_v27 }
  0xe7   :  { %v324_v28 = vpop.f32.mrb[0].mxu0  ;;  %v336_v29 = vpop.f32.mrb[0].mxu1 }
  0xe8   :  { %v230_v30 = vmax.f32 %v324_v28, 0.0  ;;  %v238_v31 = vmax.f32 %v336_v29, 0.0  ;;  %v150_v32 = vpop.f32.mrb[1].mxu0  ;;  %v190_v33 = vpop.f32.mrb[1].mxu1 }
  0xe9   :  { %v229_v34 = vmax.f32 %v150_v32, 0.0  ;;  %v237_v35 = vmax.f32 %v190_v33, 0.0 }
  0xea   :  { %247 = vst.msk [vmem:[%s539_s2 + $0x8] sm:$0xff] %vm245_vm1, %v230_v30  ;;  %255 = vst.msk [vmem:[%s539_s2 + $0x48] sm:$0xff] %vm245_vm1, %v238_v31 }
  0xeb   :  { %246 = vst.msk [vmem:[%s539_s2] sm:$0xff] %vm245_vm1, %v229_v34  ;;  %254 = vst.msk [vmem:[%s539_s2 + $0x40] sm:$0xff] %vm245_vm1, %v237_v35  ;;  %v327_v36 = vpop.f32.mrb[2].mxu0  ;;  %v339_v37 = vpop.f32.mrb[2].mxu1 }
  0xec   :  { %v232_v38 = vmax.f32 %v327_v36, 0.0  ;;  %v240_v39 = vmax.f32 %v339_v37, 0.0  ;;  %v160_v40 = vpop.f32.mrb[3].mxu0  ;;  %v200_v41 = vpop.f32.mrb[3].mxu1 }
  0xed   :  { %v231_v42 = vmax.f32 %v160_v40, 0.0  ;;  %v239_v43 = vmax.f32 %v200_v41, 0.0 }
  0xee   :  { %249 = vst.msk [vmem:[%s539_s2 + $0x18] sm:$0xff] %vm245_vm1, %v232_v38  ;;  %257 = vst.msk [vmem:[%s539_s2 + $0x58] sm:$0xff] %vm245_vm1, %v240_v39 }
  0xef   :  { %248 = vst.msk [vmem:[%s539_s2 + $0x10] sm:$0xff] %vm245_vm1, %v231_v42  ;;  %256 = vst.msk [vmem:[%s539_s2 + $0x50] sm:$0xff] %vm245_vm1, %v239_v43  ;;  %v330_v44 = vpop.f32.mrb[4].mxu0  ;;  %v342_v45 = vpop.f32.mrb[4].mxu1 }
  0xf0   :  { %v234_v46 = vmax.f32 %v330_v44, 0.0  ;;  %v242_v47 = vmax.f32 %v342_v45, 0.0  ;;  %v170_v48 = vpop.f32.mrb[5].mxu0  ;;  %v210_v49 = vpop.f32.mrb[5].mxu1 }
  0xf1   :  { %v233_v50 = vmax.f32 %v170_v48, 0.0  ;;  %v241_v51 = vmax.f32 %v210_v49, 0.0 }
  0xf2   :  { %251 = vst.msk [vmem:[%s539_s2 + $0x28] sm:$0xff] %vm245_vm1, %v234_v46  ;;  %259 = vst.msk [vmem:[%s539_s2 + $0x68] sm:$0xff] %vm245_vm1, %v242_v47 }
  0xf3   :  { %250 = vst.msk [vmem:[%s539_s2 + $0x20] sm:$0xff] %vm245_vm1, %v233_v50  ;;  %258 = vst.msk [vmem:[%s539_s2 + $0x60] sm:$0xff] %vm245_vm1, %v241_v51  ;;  %v333_v52 = vpop.f32.mrb[6].mxu0  ;;  %v345_v53 = vpop.f32.mrb[6].mxu1 }
  0xf4   :  { %v236_v54 = vmax.f32 %v333_v52, 0.0  ;;  %v244_v55 = vmax.f32 %v345_v53, 0.0  ;;  %v180_v56 = vpop.f32.mrb[7].mxu0  ;;  %v220_v57 = vpop.f32.mrb[7].mxu1 }
  0xf5   :  { %v235_v58 = vmax.f32 %v180_v56, 0.0  ;;  %v243_v59 = vmax.f32 %v220_v57, 0.0 }
  0xf6   :  { %253 = vst.msk [vmem:[%s539_s2 + $0x38] sm:$0xff] %vm245_vm1, %v236_v54  ;;  %261 = vst.msk [vmem:[%s539_s2 + $0x78] sm:$0xff] %vm245_vm1, %v244_v55 }
  0xf7   :  { %252 = vst.msk [vmem:[%s539_s2 + $0x30] sm:$0xff] %vm245_vm1, %v235_v58  ;;  %260 = vst.msk [vmem:[%s539_s2 + $0x70] sm:$0xff] %vm245_vm1, %v243_v59 }

// kernel: unet_innermost_forward.4
= control target key start
LH: loop header
LB: loop body
LE: loop exit
PB: predicated region body
PF: predicated region fallthrough
CT: control target
= control target key end

     0   :  { %s878_s12 = smov 0   ;;  %s880_s13 = smov 0   ;;  %s1044_s0 = inlined_call_operand.vmem [shape: f32[4,128,32], index: 0, kind: input, shape index: {}]   ;;  %s1045_s1 = inlined_call_operand.vmem [shape: f32[4,32,4], index: 1, kind: input, shape index: {}]   ;;  %s1046_s2 = inlined_call_operand.vmem [shape: f32[4,128,4], index: 2, kind: output, shape index: {0}]   ;;  %s1047_s3 = inlined_call_operand.vmem [shape: f32[4,1,2,4], index: 3, kind: output, shape index: {1}]  }
   0x1   :  { %s882_s14 = smov 0  }
   0x2 LB: > { %s26_s15 = sadd.s32 1, %s852_s13  ;;  %p717_p0 = scmp.ge.s32.totalorder %s856_s14, 1  ;;  %s856_s14 = sphi %s882_s14, %s14_s14   ;;  %s852_s13 = sphi %s880_s13, %s1049_s13   ;;  %s848_s12 = sphi %s878_s12, %s1048_s12  }
   0x3   : > { %p28_p1 = scmp.ge.s32.totalorder %s26_s15, 4  ;;  %p173_p2 = scmp.lt.s32.totalorder %s856_s14, 5 }
   0x5   : > { %s1051_s15 = smov (%p28_p1, %s26_s15), 0  ;;  %p174_p3 = pnand %p717_p0, %p173_p2 }
   0x6   : > { %p218_p4 = scmp.lt.s32.totalorder (!%p174_p3), %s848_s12, 3  ;;  %vm269_vm0 = vcmask (!%p174_p3), 261120   ;;  %vm463_vm1 = vcmask (!%p174_p3), 31744   ;;  %vm517_vm2 = vcmask (!%p174_p3), 24576  }
   0x7   : > { %177 = sbr.rel (%p174_p3) target bundleno = 289 (0x121), region = 28 }
   0xe   : > { %s1053_s12 = smov (!%p218_p4, %s848_s12), 3 }
   0xf   : > { %s743_s16 = sshll.u32 %s1053_s12, 7  ;;  %s744_s17 = sshll.u32 %s1053_s12, 5 }
  0x10   : > { %s905_s20 = scalar_lea.vmem %s1044_s0, %s743_s16  ;;  %s231_s23 = scalar_lea.vmem %s1045_s1, %s744_s17 }
  0x11   : > { %v265_v0 = vld [vmem:[%s231_s23] sm:$0xff]  ;;  %v266_v1 = vld [vmem:[%s231_s23 + $0x8] sm:$0xff]  ;;  %v267_v2 = vld [vmem:[%s231_s23 + $0x10] sm:$0xff]  ;;  %s947_s26 = scalar_lea.vmem %s1046_s2, %s743_s16  ;;  %s724_s27 = sshll.u32 %s1053_s12, 1 }
  0x12   : > { %v798_v3 = vpack.c.bf16 %v266_v1, %v265_v0  ;;  %v268_v4 = vld [vmem:[%s231_s23 + $0x18] sm:$0xff]  ;;  %v249_v5 = vld [vmem:[%s905_s20] sm:$0xff]  ;;  %v250_v8 = vld [vmem:[%s905_s20 + $0x8] sm:$0xff]  ;;  %s248_s30 = scalar_lea.vmem %s1047_s3, %s724_s27 }
  0x13   : > { %v802_v6 = vpack.c.bf16 %v268_v4, %v267_v2  ;;  %774 = vmatprep.mubr.msk.f32.mxu0 %vm269_vm0, %v249_v5  ;;  %v257_v7 = vld [vmem:[%s905_s20 + $0x40] sm:$0xff]  ;;  %v258_v9 = vld [vmem:[%s905_s20 + $0x48] sm:$0xff]  ;;  %v251_v10 = vld [vmem:[%s905_s20 + $0x10] sm:$0xff] }
  0x14   : > { %799 = vmatprep.subr.bf16.mxu0 %v798_v3  ;;  %806 = vmatprep.subr.bf16.mxu1 %v798_v3  ;;  %v259_v11 = vld [vmem:[%s905_s20 + $0x50] sm:$0xff]  ;;  %v252_v12 = vld [vmem:[%s905_s20 + $0x18] sm:$0xff]  ;;  %v253_v14 = vld [vmem:[%s905_s20 + $0x20] sm:$0xff] }
  0x15   : > { %801 = vmatpush3.bf16.msra.mxu0 %v798_v3  ;;  %808 = vmatpush3.bf16.msra.mxu1 %v798_v3  ;;  %v260_v13 = vld [vmem:[%s905_s20 + $0x58] sm:$0xff]  ;;  %v261_v15 = vld [vmem:[%s905_s20 + $0x60] sm:$0xff]  ;;  %v254_v16 = vld [vmem:[%s905_s20 + $0x28] sm:$0xff] }
  0x16   : > { %803 = vmatprep.subr.bf16.mxu0 %v802_v6  ;;  %807 = vmatprep.subr.bf16.mxu1 %v802_v6  ;;  %v262_v17 = vld [vmem:[%s905_s20 + $0x68] sm:$0xff]  ;;  %v255_v18 = vld [vmem:[%s905_s20 + $0x30] sm:$0xff]  ;;  %v256_v20 = vld [vmem:[%s905_s20 + $0x38] sm:$0xff] }
  0x17   : > { %786 = vmatprep.mubr.msk.f32.mxu1 %vm269_vm0, %v257_v7  ;;  %v263_v19 = vld [vmem:[%s905_s20 + $0x70] sm:$0xff]  ;;  %v264_v21 = vld [vmem:[%s905_s20 + $0x78] sm:$0xff] }
  0x19   : > { %805 = vmatpush3.bf16.msra.mxu0 %v802_v6  ;;  %809 = vmatpush3.bf16.msra.mxu1 %v802_v6 }
  0x1c   : > { %775 = vmatmul.mubr.msk.f32.vlgmr.msra.gmra.mrb[0].mxu0 %vm269_vm0, %v250_v8  ;;  %787 = vmatmul.mubr.msk.f32.vlgmr.msra.gmra.mrb[0].mxu1 %vm269_vm0, %v258_v9 }
  0x1d   : > { %777 = vmatprep.mubr.msk.f32.mxu0 %vm269_vm0, %v251_v10  ;;  %789 = vmatprep.mubr.msk.f32.mxu1 %vm269_vm0, %v259_v11 }
  0x20   : > { %778 = vmatmul.mubr.msk.f32.gmra.mrb[2].mxu0 %vm269_vm0, %v252_v12  ;;  %790 = vmatmul.mubr.msk.f32.gmra.mrb[2].mxu1 %vm269_vm0, %v260_v13 }
  0x21   : > { %780 = vmatprep.mubr.msk.f32.mxu0 %vm269_vm0, %v253_v14  ;;  %792 = vmatprep.mubr.msk.f32.mxu1 %vm269_vm0, %v261_v15 }
  0x24   : > { %781 = vmatmul.mubr.msk.f32.gmra.mrb[4].mxu0 %vm269_vm0, %v254_v16  ;;  %793 = vmatmul.mubr.msk.f32.gmra.mrb[4].mxu1 %vm269_vm0, %v262_v17 }
  0x25   : > { %783 = vmatprep.mubr.msk.f32.mxu0 %vm269_vm0, %v255_v18  ;;  %795 = vmatprep.mubr.msk.f32.mxu1 %vm269_vm0, %v263_v19 }
  0x28   : > { %784 = vmatmul.mubr.msk.f32.gmra.mrb[6].mxu0 %vm269_vm0, %v256_v20  ;;  %796 = vmatmul.mubr.msk.f32.gmra.mrb[6].mxu1 %vm269_vm0, %v264_v21 }
  0xef   : > { %v776_v22 = vpop.f32.mrb[0].mxu0  ;;  %v949_v23 = vpop.f32.mrb[0].mxu1 }
  0xf0   : > { %465 = vst.msk [vmem:[%s947_s26 + $0x8] sm:$0xff] %vm463_vm1, %v776_v22  ;;  %v481_v24 = vsel %vm463_vm1, %v776_v22, 0.0  ;;  %v520_v25 = vmul.f32 %v776_v22, %v776_v22  ;;  %v384_v26 = vpop.f32.mrb[1].mxu0  ;;  %473 = vst.msk [vmem:[%s947_s26 + $0x48] sm:$0xff] %vm463_vm1, %v949_v23  ;;  %v424_v27 = vpop.f32.mrb[1].mxu1  ;;  %v528_v13 = vmul.f32 %v949_v23, %v949_v23  ;;  %v497_v18 = vsel %vm463_vm1, %v949_v23, 0.0 }
  0xf1   : > { %464 = vst.msk [vmem:[%s947_s26] sm:$0xff] %vm463_vm1, %v384_v26  ;;  %v480_v28 = vsel %vm463_vm1, %v384_v26, 0.0  ;;  %v519_v29 = vmul.f32 %v384_v26, %v384_v26  ;;  %472 = vst.msk [vmem:[%s947_s26 + $0x40] sm:$0xff] %vm463_vm1, %v424_v27  ;;  %v527_v63 = vmul.f32 %v424_v27, %v424_v27  ;;  %v495_v9 = vsel %vm463_vm1, %v424_v27, 0.0 }
  0xf2   : > { %v536_v30 = vsel %vm463_vm1, %v520_v25, 0.0  ;;  %v482_v31 = vadd.f32 %v481_v24, %v480_v28  ;;  %v552_v22 = vsel %vm463_vm1, %v528_v13, 0.0 }
  0xf3   : > { %v535_v32 = vsel %vm463_vm1, %v519_v29, 0.0  ;;  %v779_v33 = vpop.f32.mrb[2].mxu0  ;;  %v964_v34 = vpop.f32.mrb[2].mxu1  ;;  %v550_v14 = vsel %vm463_vm1, %v527_v63, 0.0 }
  0xf4   : > { %v537_v35 = vadd.f32 %v536_v30, %v535_v32  ;;  %467 = vst.msk [vmem:[%s947_s26 + $0x18] sm:$0xff] %vm463_vm1, %v779_v33  ;;  %v394_v36 = vpop.f32.mrb[3].mxu0  ;;  %475 = vst.msk [vmem:[%s947_s26 + $0x58] sm:$0xff] %vm463_vm1, %v964_v34  ;;  %v434_v37 = vpop.f32.mrb[3].mxu1  ;;  %v522_v38 = vmul.f32 %v779_v33, %v779_v33  ;;  %v485_v42 = vsel %vm463_vm1, %v779_v33, 0.0  ;;  %v530_v24 = vmul.f32 %v964_v34, %v964_v34 }
  0xf5   : > { %466 = vst.msk [vmem:[%s947_s26 + $0x10] sm:$0xff] %vm463_vm1, %v394_v36  ;;  %v483_v39 = vsel %vm463_vm1, %v394_v36, 0.0  ;;  %v521_v40 = vmul.f32 %v394_v36, %v394_v36  ;;  %474 = vst.msk [vmem:[%s947_s26 + $0x50] sm:$0xff] %vm463_vm1, %v434_v37  ;;  %v529_v15 = vmul.f32 %v434_v37, %v434_v37  ;;  %v499_v19 = vsel %vm463_vm1, %v434_v37, 0.0 }
  0xf6   : > { %v484_v41 = vadd.f32 %v483_v39, %v482_v31  ;;  %v540_v50 = vsel %vm463_vm1, %v522_v38, 0.0  ;;  %v501_v29 = vsel %vm463_vm1, %v964_v34, 0.0  ;;  %v556_v32 = vsel %vm463_vm1, %v530_v24, 0.0 }
  0xf7   : > { %v538_v43 = vsel %vm463_vm1, %v521_v40, 0.0  ;;  %v782_v44 = vpop.f32.mrb[4].mxu0  ;;  %v978_v45 = vpop.f32.mrb[4].mxu1  ;;  %v554_v25 = vsel %vm463_vm1, %v529_v15, 0.0 }
  0xf8   : > { %v539_v46 = vadd.f32 %v538_v43, %v537_v35  ;;  %469 = vst.msk [vmem:[%s947_s26 + $0x28] sm:$0xff] %vm463_vm1, %v782_v44  ;;  %v404_v47 = vpop.f32.mrb[5].mxu0  ;;  %v486_v48 = vadd.f32 %v485_v42, %v484_v41  ;;  %477 = vst.msk [vmem:[%s947_s26 + $0x68] sm:$0xff] %vm463_vm1, %v978_v45  ;;  %v444_v49 = vpop.f32.mrb[5].mxu1  ;;  %v524_v51 = vmul.f32 %v782_v44, %v782_v44  ;;  %v489_v56 = vsel %vm463_vm1, %v782_v44, 0.0 }
  0xf9   : > { %468 = vst.msk [vmem:[%s947_s26 + $0x20] sm:$0xff] %vm463_vm1, %v404_v47  ;;  %v487_v52 = vsel %vm463_vm1, %v404_v47, 0.0  ;;  %v523_v53 = vmul.f32 %v404_v47, %v404_v47  ;;  %476 = vst.msk [vmem:[%s947_s26 + $0x60] sm:$0xff] %vm463_vm1, %v444_v49  ;;  %v531_v26 = vmul.f32 %v444_v49, %v444_v49  ;;  %v503_v30 = vsel %vm463_vm1, %v444_v49, 0.0 }
  0xfa   : > { %v488_v54 = vadd.f32 %v487_v52, %v486_v48  ;;  %v541_v55 = vadd.f32 %v540_v50, %v539_v46  ;;  %v544_v1 = vsel %vm463_vm1, %v524_v51, 0.0  ;;  %v532_v33 = vmul.f32 %v978_v45, %v978_v45 }
  0xfb   : > { %v542_v57 = vsel %vm463_vm1, %v523_v53, 0.0  ;;  %v785_v58 = vpop.f32.mrb[6].mxu0  ;;  %v797_v59 = vpop.f32.mrb[6].mxu1  ;;  %v558_v35 = vsel %vm463_vm1, %v531_v26, 0.0  ;;  %v505_v39 = vsel %vm463_vm1, %v978_v45, 0.0 }
  0xfc   : > { %v543_v60 = vadd.f32 %v542_v57, %v541_v55  ;;  %471 = vst.msk [vmem:[%s947_s26 + $0x38] sm:$0xff] %vm463_vm1, %v785_v58  ;;  %v414_v61 = vpop.f32.mrb[7].mxu0  ;;  %v490_v62 = vadd.f32 %v489_v56, %v488_v54  ;;  %479 = vst.msk [vmem:[%s947_s26 + $0x78] sm:$0xff] %vm463_vm1, %v797_v59  ;;  %v454_v0 = vpop.f32.mrb[7].mxu1  ;;  %v526_v2 = vmul.f32 %v785_v58, %v785_v58  ;;  %v493_v7 = vsel %vm463_vm1, %v785_v58, 0.0 }
  0xfd   : > { %470 = vst.msk [vmem:[%s947_s26 + $0x30] sm:$0xff] %vm463_vm1, %v414_v61  ;;  %v491_v3 = vsel %vm463_vm1, %v414_v61, 0.0  ;;  %v525_v4 = vmul.f32 %v414_v61, %v414_v61  ;;  %478 = vst.msk [vmem:[%s947_s26 + $0x70] sm:$0xff] %vm463_vm1, %v454_v0  ;;  %v533_v36 = vmul.f32 %v454_v0, %v454_v0  ;;  %v507_v40 = vsel %vm463_vm1, %v454_v0, 0.0 }
  0xfe   : > { %v492_v5 = vadd.f32 %v491_v3, %v490_v62  ;;  %v545_v6 = vadd.f32 %v544_v1, %v543_v60  ;;  %v548_v12 = vsel %vm463_vm1, %v526_v2, 0.0  ;;  %v560_v42 = vsel %vm463_vm1, %v532_v33, 0.0 }
  0xff   : > { %v546_v8 = vsel %vm463_vm1, %v525_v4, 0.0  ;;  %v534_v43 = vmul.f32 %v797_v59, %v797_v59  ;;  %v562_v44 = vsel %vm463_vm1, %v533_v36, 0.0  ;;  %v509_v48 = vsel %vm463_vm1, %v797_v59, 0.0 }
 0x100   : > { %v494_v10 = vadd.f32 %v493_v7, %v492_v5  ;;  %v547_v11 = vadd.f32 %v546_v8, %v545_v6 }
 0x101   : > { %v564_v51 = vsel %vm463_vm1, %v534_v43, 0.0 }
 0x102   : > { %v549_v16 = vadd.f32 %v548_v12, %v547_v11  ;;  %v496_v17 = vadd.f32 %v495_v9, %v494_v10 }
 0x104   : > { %v551_v20 = vadd.f32 %v550_v14, %v549_v16  ;;  %v498_v21 = vadd.f32 %v497_v18, %v496_v17 }
 0x106   : > { %v500_v27 = vadd.f32 %v499_v19, %v498_v21  ;;  %v553_v28 = vadd.f32 %v552_v22, %v551_v20 }
 0x108   : > { %v555_v23 = vadd.f32 %v554_v25, %v553_v28  ;;  %v502_v31 = vadd.f32 %v501_v29, %v500_v27 }
 0x10a   : > { %v504_v37 = vadd.f32 %v503_v30, %v502_v31  ;;  %v557_v38 = vadd.f32 %v556_v32, %v555_v23 }
 0x10c   : > { %v559_v34 = vadd.f32 %v558_v35, %v557_v38  ;;  %v506_v41 = vadd.f32 %v505_v39, %v504_v37 }
 0x10e   : > { %v508_v46 = vadd.f32 %v507_v40, %v506_v41  ;;  %v561_v47 = vadd.f32 %v560_v42, %v559_v34 }
 0x110   : > { %v510_v49 = vadd.f32 %v509_v48, %v508_v46  ;;  %v563_v50 = vadd.f32 %v562_v44, %v561_v47 }
 0x112   : > { %v511_v52 = vrot.slane %v510_v49, 4  ;;  %v565_v45 = vadd.f32 %v564_v51, %v563_v50 }
 0x114   : > { %v512_v53 = vadd.f32 %v511_v52, %v510_v49  ;;  %v566_v54 = vrot.slane %v565_v45, 4 }
 0x116   : > { %v513_v55 = vrot.slane %v512_v53, 2  ;;  %v567_v56 = vadd.f32 %v566_v54, %v565_v45 }
 0x118   : > { %v514_v57 = vadd.f32 %v513_v55, %v512_v53  ;;  %v568_v58 = vrot.slane %v567_v56, 2 }
 0x11a   : > { %v515_v60 = vrot.slane %v514_v57, 1  ;;  %v569_v61 = vadd.f32 %v568_v58, %v567_v56 }
 0x11c   : > { %v516_v59 = vadd.f32 %v515_v60, %v514_v57  ;;  %v570_v62 = vrot.slane %v569_v61, 1 }
 0x11e   : > { %518 = vst.msk [vmem:[%s248_s30] sm:$0x1] %vm517_vm2, %v516_v59  ;;  %v571_v63 = vadd.f32 %v570_v62, %v569_v61 }
 0x120   : > { %572 = vst.msk [vmem:[%s248_s30 + $0x1] sm:$0x1] %vm517_vm2, %v571_v63 }
 0x121 PF: > { %s14_s14 = sadd.s32 1, %s856_s14   ;;  %s1048_s12 = smov %s852_s13 }
 0x122   : > { %p11_p5 = scmp.ge.s32.totalorder %s14_s14, 6   ;;  %s1049_s13 = smov %s1051_s15 }
 0x124   :  { %13 = sbr.rel (!%p11_p5) target bundleno = 2 (0x2), region = 73 }

// kernel: unet_innermost_forward.5
= control target key start
LH: loop header
LB: loop body
LE: loop exit
PB: predicated region body
PF: predicated region fallthrough
CT: control target
= control target key end

     0   :  { %s680_s19 = smov 4   ;;  %vm223_vm0 = vcmask 31744   ;;  %vm608_vm1 = vcmask 64544   ;;  %s1804_s1 = inlined_call_operand.vmem [shape: f32[512,4], index: 1, kind: input, shape index: {}]   ;;  %s1805_s2 = inlined_call_operand.vmem [shape: f32[1,4], index: 2, kind: input, shape index: {}]   ;;  %s1806_s3 = inlined_call_operand.vmem [shape: f32[1,4], index: 3, kind: input, shape index: {}]   ;;  %s1807_s0 = inlined_call_operand.vmem [shape: f32[512,4], index: 0, kind: input, shape index: {}]   ;;  %s1808_s4 = inlined_call_operand.vmem [shape: f32[512,8], index: 4, kind: output, shape index: {}]  }
   0x1   :  { %v290_v0 = vld [vmem:[%s1804_s1 + $0x10] sm:$0xff]  ;;  %v288_v1 = vld [vmem:[%s1804_s1] sm:$0xff]  ;;  %v291_v2 = vld [vmem:[%s1804_s1 + $0x18] sm:$0xff] }
   0x2   :  { %420 = vrot.lane.b32.xlu1 %v290_v0, %s680_s19  ;;  %416 = vrot.lane.b32.xlu0 %v288_v1, %s680_s19  ;;  %v289_v3 = vld [vmem:[%s1804_s1 + $0x8] sm:$0xff]  ;;  %v292_v5 = vld [vmem:[%s1804_s1 + $0x20] sm:$0xff] }
   0x3   :  { %v293_v4 = vld [vmem:[%s1804_s1 + $0x28] sm:$0xff]  ;;  %v295_v6 = vld [vmem:[%s1804_s1 + $0x38] sm:$0xff]  ;;  %v294_v7 = vld [vmem:[%s1804_s1 + $0x30] sm:$0xff] }
   0x4   :  { %v297_v8 = vld [vmem:[%s1804_s1 + $0x48] sm:$0xff]  ;;  %v296_v9 = vld [vmem:[%s1804_s1 + $0x40] sm:$0xff]  ;;  %v299_v10 = vld [vmem:[%s1804_s1 + $0x58] sm:$0xff] }
   0x5   :  { %v298_v11 = vld [vmem:[%s1804_s1 + $0x50] sm:$0xff]  ;;  %v301_v12 = vld [vmem:[%s1804_s1 + $0x68] sm:$0xff]  ;;  %v300_v13 = vld [vmem:[%s1804_s1 + $0x60] sm:$0xff] }
   0x6   :  { %422 = vrot.lane.b32.xlu1 %v291_v2, %s680_s19  ;;  %418 = vrot.lane.b32.xlu0 %v289_v3, %s680_s19  ;;  %v763_v14 = vld [vmem:[%s1805_s2] ss:$0 sm:$0xff]  ;;  %v19_v16 = vld [vmem:[%s1807_s0 + $0x10] sm:$0xff] }
   0x7   :  { %v768_v15 = vld [vmem:[%s1806_s3] ss:$0 sm:$0xff]  ;;  %v90_v18 = vmul.f32 %v763_v14, %v19_v16  ;;  %v20_v20 = vld [vmem:[%s1807_s0 + $0x18] sm:$0xff]  ;;  %v18_v21 = vld [vmem:[%s1807_s0 + $0x8] sm:$0xff] }
   0x8   :  { %v17_v17 = vld [vmem:[%s1807_s0] sm:$0xff]  ;;  %v91_v22 = vmul.f32 %v763_v14, %v20_v20  ;;  %v89_v23 = vmul.f32 %v763_v14, %v18_v21  ;;  %v22_v24 = vld [vmem:[%s1807_s0 + $0x28] sm:$0xff]  ;;  %v303_v25 = vld [vmem:[%s1804_s1 + $0x78] sm:$0xff] }
   0x9   :  { %v88_v19 = vmul.f32 %v763_v14, %v17_v17  ;;  %v161_v26 = vadd.f32 %v768_v15, %v90_v18  ;;  %v93_v28 = vmul.f32 %v763_v14, %v22_v24  ;;  %v21_v29 = vld [vmem:[%s1807_s0 + $0x20] sm:$0xff]  ;;  %v302_v30 = vld [vmem:[%s1804_s1 + $0x70] sm:$0xff]  ;;  %v24_v34 = vld [vmem:[%s1807_s0 + $0x38] sm:$0xff] }
   0xa   :  { %426 = vrot.lane.b32.xlu1 %v293_v4, %s680_s19  ;;  %424 = vrot.lane.b32.xlu0 %v292_v5, %s680_s19  ;;  %v162_v31 = vadd.f32 %v768_v15, %v91_v22  ;;  %v160_v32 = vadd.f32 %v768_v15, %v89_v23  ;;  %v92_v33 = vmul.f32 %v763_v14, %v21_v29  ;;  %v23_v35 = vld [vmem:[%s1807_s0 + $0x30] sm:$0xff]  ;;  %v26_v39 = vld [vmem:[%s1807_s0 + $0x48] sm:$0xff] }
   0xb   :  { %v159_v27 = vadd.f32 %v768_v15, %v88_v19  ;;  %226 = vst.msk [vmem:[%s1808_s4 + $0x10] sm:$0xff] %vm223_vm0, %v161_v26  ;;  %v164_v36 = vadd.f32 %v768_v15, %v93_v28  ;;  %v95_v37 = vmul.f32 %v763_v14, %v24_v34  ;;  %v94_v38 = vmul.f32 %v763_v14, %v23_v35  ;;  %v25_v40 = vld [vmem:[%s1807_s0 + $0x40] sm:$0xff]  ;;  %v28_v41 = vld [vmem:[%s1807_s0 + $0x58] sm:$0xff]  ;;  %v305_v42 = vld [vmem:[%s1804_s1 + $0x88] sm:$0xff] }
   0xc   :  { %v304_v43 = vld [vmem:[%s1804_s1 + $0x80] sm:$0xff]  ;;  %227 = vst.msk [vmem:[%s1808_s4 + $0x18] sm:$0xff] %vm223_vm0, %v162_v31  ;;  %225 = vst.msk [vmem:[%s1808_s4 + $0x8] sm:$0xff] %vm223_vm0, %v160_v32  ;;  %v163_v44 = vadd.f32 %v768_v15, %v92_v33  ;;  %v97_v45 = vmul.f32 %v763_v14, %v26_v39  ;;  %v96_v46 = vmul.f32 %v763_v14, %v25_v40  ;;  %v27_v48 = vld [vmem:[%s1807_s0 + $0x50] sm:$0xff] }
   0xd   :  { %224 = vst.msk [vmem:[%s1808_s4] sm:$0xff] %vm223_vm0, %v159_v27  ;;  %v99_v47 = vmul.f32 %v763_v14, %v28_v41  ;;  %v30_v49 = vld [vmem:[%s1807_s0 + $0x68] sm:$0xff]  ;;  %v29_v50 = vld [vmem:[%s1807_s0 + $0x60] sm:$0xff]  ;;  %229 = vst.msk [vmem:[%s1808_s4 + $0x28] sm:$0xff] %vm223_vm0, %v164_v36  ;;  %v166_v51 = vadd.f32 %v768_v15, %v95_v37  ;;  %v165_v52 = vadd.f32 %v768_v15, %v94_v38 }
   0xe   :  { %430 = vrot.lane.b32.xlu1 %v295_v6, %s680_s19  ;;  %428 = vrot.lane.b32.xlu0 %v294_v7, %s680_s19  ;;  %v98_v53 = vmul.f32 %v763_v14, %v27_v48  ;;  %v32_v54 = vld [vmem:[%s1807_s0 + $0x78] sm:$0xff]  ;;  %v31_v55 = vld [vmem:[%s1807_s0 + $0x70] sm:$0xff]  ;;  %v168_v56 = vadd.f32 %v768_v15, %v97_v45  ;;  %v167_v57 = vadd.f32 %v768_v15, %v96_v46 }
   0xf   :  { %228 = vst.msk [vmem:[%s1808_s4 + $0x20] sm:$0xff] %vm223_vm0, %v163_v44  ;;  %v170_v58 = vadd.f32 %v768_v15, %v99_v47  ;;  %v101_v59 = vmul.f32 %v763_v14, %v30_v49  ;;  %v34_v60 = vld [vmem:[%s1807_s0 + $0x88] sm:$0xff]  ;;  %v33_v61 = vld [vmem:[%s1807_s0 + $0x80] sm:$0xff]  ;;  %v36_v62 = vld [vmem:[%s1807_s0 + $0x98] sm:$0xff]  ;;  %v100_v0 = vmul.f32 %v763_v14, %v29_v50  ;;  %v103_v1 = vmul.f32 %v763_v14, %v32_v54 }
  0x10   :  { %231 = vst.msk [vmem:[%s1808_s4 + $0x38] sm:$0xff] %vm223_vm0, %v166_v51  ;;  %230 = vst.msk [vmem:[%s1808_s4 + $0x30] sm:$0xff] %vm223_vm0, %v165_v52  ;;  %v169_v63 = vadd.f32 %v768_v15, %v98_v53  ;;  %v102_v2 = vmul.f32 %v763_v14, %v31_v55  ;;  %v35_v3 = vld [vmem:[%s1807_s0 + $0x90] sm:$0xff]  ;;  %v38_v4 = vld [vmem:[%s1807_s0 + $0xa8] sm:$0xff]  ;;  %v105_v6 = vmul.f32 %v763_v14, %v34_v60 }
  0x11   :  { %233 = vst.msk [vmem:[%s1808_s4 + $0x48] sm:$0xff] %vm223_vm0, %v168_v56  ;;  %232 = vst.msk [vmem:[%s1808_s4 + $0x40] sm:$0xff] %vm223_vm0, %v167_v57  ;;  %v172_v5 = vadd.f32 %v768_v15, %v101_v59  ;;  %v104_v7 = vmul.f32 %v763_v14, %v33_v61  ;;  %v42_v17 = vld [vmem:[%s1807_s0 + $0xc8] sm:$0xff]  ;;  %v41_v18 = vld [vmem:[%s1807_s0 + $0xc0] sm:$0xff]  ;;  %v106_v24 = vmul.f32 %v763_v14, %v35_v3 }
  0x12   :  { %434 = vrot.lane.b32.xlu1 %v297_v8, %s680_s19  ;;  %432 = vrot.lane.b32.xlu0 %v296_v9, %s680_s19  ;;  %235 = vst.msk [vmem:[%s1808_s4 + $0x58] sm:$0xff] %vm223_vm0, %v170_v58  ;;  %v107_v8 = vmul.f32 %v763_v14, %v36_v62  ;;  %v37_v9 = vld [vmem:[%s1807_s0 + $0xa0] sm:$0xff]  ;;  %v173_v16 = vadd.f32 %v768_v15, %v102_v2 }
  0x13   :  { %234 = vst.msk [vmem:[%s1808_s4 + $0x50] sm:$0xff] %vm223_vm0, %v169_v63  ;;  %v307_v19 = vld [vmem:[%s1804_s1 + $0x98] sm:$0xff]  ;;  %v306_v20 = vld [vmem:[%s1804_s1 + $0x90] sm:$0xff]  ;;  %237 = vst.msk [vmem:[%s1808_s4 + $0x68] sm:$0xff] %vm223_vm0, %v172_v5  ;;  %v176_v21 = vadd.f32 %v768_v15, %v105_v6  ;;  %v175_v22 = vadd.f32 %v768_v15, %v104_v7  ;;  %v109_v26 = vmul.f32 %v763_v14, %v38_v4 }
  0x14   :  { %v178_v23 = vadd.f32 %v768_v15, %v107_v8  ;;  %238 = vst.msk [vmem:[%s1808_s4 + $0x70] sm:$0xff] %vm223_vm0, %v173_v16  ;;  %v108_v27 = vmul.f32 %v763_v14, %v37_v9  ;;  %v113_v31 = vmul.f32 %v763_v14, %v42_v17  ;;  %v112_v32 = vmul.f32 %v763_v14, %v41_v18  ;;  %v43_v34 = vld [vmem:[%s1807_s0 + $0xd0] sm:$0xff]  ;;  %v309_v35 = vld [vmem:[%s1804_s1 + $0xa8] sm:$0xff]  ;;  %v308_v39 = vld [vmem:[%s1804_s1 + $0xa0] sm:$0xff] }
  0x15   :  { %241 = vst.msk [vmem:[%s1808_s4 + $0x88] sm:$0xff] %vm223_vm0, %v176_v21  ;;  %240 = vst.msk [vmem:[%s1808_s4 + $0x80] sm:$0xff] %vm223_vm0, %v175_v22  ;;  %v180_v36 = vadd.f32 %v768_v15, %v109_v26  ;;  %v46_v44 = vld [vmem:[%s1807_s0 + $0xe8] sm:$0xff]  ;;  %v45_v45 = vld [vmem:[%s1807_s0 + $0xe0] sm:$0xff]  ;;  %v114_v46 = vmul.f32 %v763_v14, %v43_v34 }
  0x16   :  { %438 = vrot.lane.b32.xlu1 %v299_v10, %s680_s19  ;;  %436 = vrot.lane.b32.xlu0 %v298_v11, %s680_s19  ;;  %v40_v10 = vld [vmem:[%s1807_s0 + $0xb8] sm:$0xff]  ;;  %v39_v11 = vld [vmem:[%s1807_s0 + $0xb0] sm:$0xff]  ;;  %v179_v37 = vadd.f32 %v768_v15, %v108_v27  ;;  %v184_v41 = vadd.f32 %v768_v15, %v113_v31  ;;  %v117_v47 = vmul.f32 %v763_v14, %v46_v44 }
  0x17   :  { %v111_v28 = vmul.f32 %v763_v14, %v40_v10  ;;  %v110_v29 = vmul.f32 %v763_v14, %v39_v11  ;;  %243 = vst.msk [vmem:[%s1808_s4 + $0x98] sm:$0xff] %vm223_vm0, %v178_v23  ;;  %245 = vst.msk [vmem:[%s1808_s4 + $0xa8] sm:$0xff] %vm223_vm0, %v180_v36  ;;  %v116_v48 = vmul.f32 %v763_v14, %v45_v45  ;;  %v311_v49 = vld [vmem:[%s1804_s1 + $0xb8] sm:$0xff]  ;;  %v310_v53 = vld [vmem:[%s1804_s1 + $0xb0] sm:$0xff] }
  0x18   :  { %244 = vst.msk [vmem:[%s1808_s4 + $0xa0] sm:$0xff] %vm223_vm0, %v179_v37  ;;  %249 = vst.msk [vmem:[%s1808_s4 + $0xc8] sm:$0xff] %vm223_vm0, %v184_v41  ;;  %v185_v50 = vadd.f32 %v768_v15, %v114_v46  ;;  %v188_v51 = vadd.f32 %v768_v15, %v117_v47  ;;  %v48_v54 = vld [vmem:[%s1807_s0 + $0xf8] sm:$0xff]  ;;  %v47_v55 = vld [vmem:[%s1807_s0 + $0xf0] sm:$0xff] }
  0x19   :  { %v182_v38 = vadd.f32 %v768_v15, %v111_v28  ;;  %v181_v40 = vadd.f32 %v768_v15, %v110_v29  ;;  %v187_v52 = vadd.f32 %v768_v15, %v116_v48  ;;  %v119_v56 = vmul.f32 %v763_v14, %v48_v54  ;;  %v313_v58 = vld [vmem:[%s1804_s1 + $0xc8] sm:$0xff]  ;;  %v312_v61 = vld [vmem:[%s1804_s1 + $0xc0] sm:$0xff]  ;;  %v315_v2 = vld [vmem:[%s1804_s1 + $0xd8] sm:$0xff] }
  0x1a   :  { %442 = vrot.lane.b32.xlu1 %v301_v12, %s680_s19  ;;  %440 = vrot.lane.b32.xlu0 %v300_v13, %s680_s19  ;;  %v171_v12 = vadd.f32 %v768_v15, %v100_v0  ;;  %v174_v13 = vadd.f32 %v768_v15, %v103_v1  ;;  %250 = vst.msk [vmem:[%s1808_s4 + $0xd0] sm:$0xff] %vm223_vm0, %v185_v50  ;;  %253 = vst.msk [vmem:[%s1808_s4 + $0xe8] sm:$0xff] %vm223_vm0, %v188_v51 }
  0x1b   :  { %247 = vst.msk [vmem:[%s1808_s4 + $0xb8] sm:$0xff] %vm223_vm0, %v182_v38  ;;  %246 = vst.msk [vmem:[%s1808_s4 + $0xb0] sm:$0xff] %vm223_vm0, %v181_v40  ;;  %v118_v57 = vmul.f32 %v763_v14, %v47_v55  ;;  %v190_v59 = vadd.f32 %v768_v15, %v119_v56  ;;  %v50_v62 = vld [vmem:[%s1807_s0 + $0x108] sm:$0xff]  ;;  %v49_v63 = vld [vmem:[%s1807_s0 + $0x100] sm:$0xff] }
  0x1c   :  { %236 = vst.msk [vmem:[%s1808_s4 + $0x60] sm:$0xff] %vm223_vm0, %v171_v12  ;;  %239 = vst.msk [vmem:[%s1808_s4 + $0x78] sm:$0xff] %vm223_vm0, %v174_v13  ;;  %v121_v0 = vmul.f32 %v763_v14, %v50_v62  ;;  %v120_v1 = vmul.f32 %v763_v14, %v49_v63  ;;  %v314_v5 = vld [vmem:[%s1804_s1 + $0xd0] sm:$0xff]  ;;  %v52_v6 = vld [vmem:[%s1807_s0 + $0x118] sm:$0xff] }
  0x1d   :  { %252 = vst.msk [vmem:[%s1808_s4 + $0xe0] sm:$0xff] %vm223_vm0, %v187_v52  ;;  %v189_v60 = vadd.f32 %v768_v15, %v118_v57  ;;  %255 = vst.msk [vmem:[%s1808_s4 + $0xf8] sm:$0xff] %vm223_vm0, %v190_v59  ;;  %v51_v7 = vld [vmem:[%s1807_s0 + $0x110] sm:$0xff]  ;;  %v123_v8 = vmul.f32 %v763_v14, %v52_v6  ;;  %v317_v10 = vld [vmem:[%s1804_s1 + $0xe8] sm:$0xff] }
  0x1e   :  { %446 = vrot.lane.b32.xlu1 %v303_v25, %s680_s19  ;;  %444 = vrot.lane.b32.xlu0 %v302_v30, %s680_s19  ;;  %v44_v25 = vld [vmem:[%s1807_s0 + $0xd8] sm:$0xff]  ;;  %v177_v30 = vadd.f32 %v768_v15, %v106_v24  ;;  %v192_v3 = vadd.f32 %v768_v15, %v121_v0  ;;  %v191_v4 = vadd.f32 %v768_v15, %v120_v1  ;;  %v316_v13 = vld [vmem:[%s1804_s1 + $0xe0] sm:$0xff] }
  0x1f   :  { %v115_v33 = vmul.f32 %v763_v14, %v44_v25  ;;  %254 = vst.msk [vmem:[%s1808_s4 + $0xf0] sm:$0xff] %vm223_vm0, %v189_v60  ;;  %v122_v9 = vmul.f32 %v763_v14, %v51_v7  ;;  %v194_v11 = vadd.f32 %v768_v15, %v123_v8  ;;  %v54_v16 = vld [vmem:[%s1807_s0 + $0x128] sm:$0xff]  ;;  %v53_v17 = vld [vmem:[%s1807_s0 + $0x120] sm:$0xff]  ;;  %v318_v23 = vld [vmem:[%s1804_s1 + $0xf0] sm:$0xff] }
  0x20   :  { %242 = vst.msk [vmem:[%s1808_s4 + $0x90] sm:$0xff] %vm223_vm0, %v177_v30  ;;  %257 = vst.msk [vmem:[%s1808_s4 + $0x108] sm:$0xff] %vm223_vm0, %v192_v3  ;;  %v125_v18 = vmul.f32 %v763_v14, %v54_v16  ;;  %v56_v24 = vld [vmem:[%s1807_s0 + $0x138] sm:$0xff]  ;;  %v55_v25 = vld [vmem:[%s1807_s0 + $0x130] sm:$0xff] }
  0x21   :  { %256 = vst.msk [vmem:[%s1808_s4 + $0x100] sm:$0xff] %vm223_vm0, %v191_v4  ;;  %v193_v12 = vadd.f32 %v768_v15, %v122_v9  ;;  %259 = vst.msk [vmem:[%s1808_s4 + $0x118] sm:$0xff] %vm223_vm0, %v194_v11  ;;  %v127_v26 = vmul.f32 %v763_v14, %v56_v24  ;;  %v126_v27 = vmul.f32 %v763_v14, %v55_v25  ;;  %v321_v28 = vld [vmem:[%s1804_s1 + $0x108] sm:$0xff]  ;;  %v320_v31 = vld [vmem:[%s1804_s1 + $0x100] sm:$0xff] }
  0x22   :  { %450 = vrot.lane.b32.xlu1 %v305_v42, %s680_s19  ;;  %448 = vrot.lane.b32.xlu0 %v304_v43, %s680_s19  ;;  %v183_v42 = vadd.f32 %v768_v15, %v112_v32  ;;  %v186_v43 = vadd.f32 %v768_v15, %v115_v33  ;;  %v196_v21 = vadd.f32 %v768_v15, %v125_v18  ;;  %v58_v32 = vld [vmem:[%s1807_s0 + $0x148] sm:$0xff]  ;;  %v57_v33 = vld [vmem:[%s1807_s0 + $0x140] sm:$0xff] }
  0x23   :  { %258 = vst.msk [vmem:[%s1808_s4 + $0x110] sm:$0xff] %vm223_vm0, %v193_v12  ;;  %v198_v29 = vadd.f32 %v768_v15, %v127_v26  ;;  %v197_v30 = vadd.f32 %v768_v15, %v126_v27  ;;  %v129_v34 = vmul.f32 %v763_v14, %v58_v32  ;;  %v323_v36 = vld [vmem:[%s1804_s1 + $0x118] sm:$0xff]  ;;  %v59_v41 = vld [vmem:[%s1807_s0 + $0x150] sm:$0xff]  ;;  %v325_v44 = vld [vmem:[%s1804_s1 + $0x128] sm:$0xff] }
  0x24   :  { %248 = vst.msk [vmem:[%s1808_s4 + $0xc0] sm:$0xff] %vm223_vm0, %v183_v42  ;;  %251 = vst.msk [vmem:[%s1808_s4 + $0xd8] sm:$0xff] %vm223_vm0, %v186_v43  ;;  %v60_v40 = vld [vmem:[%s1807_s0 + $0x158] sm:$0xff]  ;;  %v130_v43 = vmul.f32 %v763_v14, %v59_v41  ;;  %v324_v47 = vld [vmem:[%s1804_s1 + $0x120] sm:$0xff] }
  0x25   :  { %261 = vst.msk [vmem:[%s1808_s4 + $0x128] sm:$0xff] %vm223_vm0, %v196_v21  ;;  %263 = vst.msk [vmem:[%s1808_s4 + $0x138] sm:$0xff] %vm223_vm0, %v198_v29  ;;  %v200_v37 = vadd.f32 %v768_v15, %v129_v34  ;;  %v131_v42 = vmul.f32 %v763_v14, %v60_v40  ;;  %v62_v48 = vld [vmem:[%s1807_s0 + $0x168] sm:$0xff]  ;;  %v327_v52 = vld [vmem:[%s1804_s1 + $0x138] sm:$0xff] }
  0x26   :  { %454 = vrot.lane.b32.xlu1 %v307_v19, %s680_s19  ;;  %452 = vrot.lane.b32.xlu0 %v306_v20, %s680_s19  ;;  %v124_v19 = vmul.f32 %v763_v14, %v53_v17  ;;  %v319_v20 = vld [vmem:[%s1804_s1 + $0xf8] sm:$0xff]  ;;  %262 = vst.msk [vmem:[%s1808_s4 + $0x130] sm:$0xff] %vm223_vm0, %v197_v30  ;;  %v201_v46 = vadd.f32 %v768_v15, %v130_v43 }
  0x27   :  { %265 = vst.msk [vmem:[%s1808_s4 + $0x148] sm:$0xff] %vm223_vm0, %v200_v37  ;;  %v202_v45 = vadd.f32 %v768_v15, %v131_v42  ;;  %v133_v50 = vmul.f32 %v763_v14, %v62_v48  ;;  %v326_v55 = vld [vmem:[%s1804_s1 + $0x130] sm:$0xff]  ;;  %v64_v56 = vld [vmem:[%s1807_s0 + $0x178] sm:$0xff]  ;;  %v329_v60 = vld [vmem:[%s1804_s1 + $0x148] sm:$0xff] }
  0x28   :  { %v195_v22 = vadd.f32 %v768_v15, %v124_v19  ;;  %266 = vst.msk [vmem:[%s1808_s4 + $0x150] sm:$0xff] %vm223_vm0, %v201_v46  ;;  %v63_v57 = vld [vmem:[%s1807_s0 + $0x170] sm:$0xff]  ;;  %v328_v63 = vld [vmem:[%s1804_s1 + $0x140] sm:$0xff]  ;;  %v66_v0 = vld [vmem:[%s1807_s0 + $0x188] sm:$0xff] }
  0x29   :  { %267 = vst.msk [vmem:[%s1808_s4 + $0x158] sm:$0xff] %vm223_vm0, %v202_v45  ;;  %v134_v59 = vmul.f32 %v763_v14, %v63_v57  ;;  %v65_v1 = vld [vmem:[%s1807_s0 + $0x180] sm:$0xff]  ;;  %v331_v4 = vld [vmem:[%s1804_s1 + $0x158] sm:$0xff]  ;;  %v330_v7 = vld [vmem:[%s1804_s1 + $0x150] sm:$0xff] }
  0x2a   :  { %458 = vrot.lane.b32.xlu1 %v309_v35, %s680_s19  ;;  %456 = vrot.lane.b32.xlu0 %v308_v39, %s680_s19  ;;  %260 = vst.msk [vmem:[%s1808_s4 + $0x120] sm:$0xff] %vm223_vm0, %v195_v22  ;;  %v128_v35 = vmul.f32 %v763_v14, %v57_v33  ;;  %v322_v39 = vld [vmem:[%s1804_s1 + $0x110] sm:$0xff]  ;;  %v136_v3 = vmul.f32 %v763_v14, %v65_v1 }
  0x2b   :  { %v205_v62 = vadd.f32 %v768_v15, %v134_v59  ;;  %v68_v8 = vld [vmem:[%s1807_s0 + $0x198] sm:$0xff]  ;;  %v67_v9 = vld [vmem:[%s1807_s0 + $0x190] sm:$0xff]  ;;  %v333_v12 = vld [vmem:[%s1804_s1 + $0x168] sm:$0xff] }
  0x2c   :  { %v199_v38 = vadd.f32 %v768_v15, %v128_v35  ;;  %v207_v6 = vadd.f32 %v768_v15, %v136_v3  ;;  %v138_v11 = vmul.f32 %v763_v14, %v67_v9  ;;  %v332_v17 = vld [vmem:[%s1804_s1 + $0x160] sm:$0xff]  ;;  %v70_v18 = vld [vmem:[%s1807_s0 + $0x1a8] sm:$0xff]  ;;  %v335_v22 = vld [vmem:[%s1804_s1 + $0x178] sm:$0xff] }
  0x2d   :  { %270 = vst.msk [vmem:[%s1808_s4 + $0x170] sm:$0xff] %vm223_vm0, %v205_v62  ;;  %v69_v19 = vld [vmem:[%s1807_s0 + $0x1a0] sm:$0xff]  ;;  %v334_v25 = vld [vmem:[%s1804_s1 + $0x170] sm:$0xff]  ;;  %v72_v26 = vld [vmem:[%s1807_s0 + $0x1b8] sm:$0xff] }
  0x2e   :  { %462 = vrot.lane.b32.xlu1 %v311_v49, %s680_s19  ;;  %460 = vrot.lane.b32.xlu0 %v310_v53, %s680_s19  ;;  %264 = vst.msk [vmem:[%s1808_s4 + $0x140] sm:$0xff] %vm223_vm0, %v199_v38  ;;  %v61_v49 = vld [vmem:[%s1807_s0 + $0x160] sm:$0xff]  ;;  %v204_v53 = vadd.f32 %v768_v15, %v133_v50  ;;  %v209_v16 = vadd.f32 %v768_v15, %v138_v11 }
  0x2f   :  { %v132_v51 = vmul.f32 %v763_v14, %v61_v49  ;;  %272 = vst.msk [vmem:[%s1808_s4 + $0x180] sm:$0xff] %vm223_vm0, %v207_v6  ;;  %v140_v21 = vmul.f32 %v763_v14, %v69_v19  ;;  %v71_v27 = vld [vmem:[%s1807_s0 + $0x1b0] sm:$0xff]  ;;  %v337_v30 = vld [vmem:[%s1804_s1 + $0x188] sm:$0xff]  ;;  %v336_v33 = vld [vmem:[%s1804_s1 + $0x180] sm:$0xff] }
  0x30   :  { %269 = vst.msk [vmem:[%s1808_s4 + $0x168] sm:$0xff] %vm223_vm0, %v204_v53  ;;  %274 = vst.msk [vmem:[%s1808_s4 + $0x190] sm:$0xff] %vm223_vm0, %v209_v16  ;;  %v142_v29 = vmul.f32 %v763_v14, %v71_v27  ;;  %v74_v34 = vld [vmem:[%s1807_s0 + $0x1c8] sm:$0xff]  ;;  %v73_v35 = vld [vmem:[%s1807_s0 + $0x1c0] sm:$0xff] }
  0x31   :  { %v203_v54 = vadd.f32 %v768_v15, %v132_v51  ;;  %v211_v24 = vadd.f32 %v768_v15, %v140_v21  ;;  %v144_v37 = vmul.f32 %v763_v14, %v73_v35  ;;  %v339_v38 = vld [vmem:[%s1804_s1 + $0x198] sm:$0xff]  ;;  %v338_v41 = vld [vmem:[%s1804_s1 + $0x190] sm:$0xff]  ;;  %v341_v46 = vld [vmem:[%s1804_s1 + $0x1a8] sm:$0xff] }
  0x32   :  { %466 = vrot.lane.b32.xlu1 %v313_v58, %s680_s19  ;;  %464 = vrot.lane.b32.xlu0 %v312_v61, %s680_s19  ;;  %v135_v58 = vmul.f32 %v763_v14, %v64_v56  ;;  %v213_v32 = vadd.f32 %v768_v15, %v142_v29  ;;  %v76_v42 = vld [vmem:[%s1807_s0 + $0x1d8] sm:$0xff]  ;;  %v75_v43 = vld [vmem:[%s1807_s0 + $0x1d0] sm:$0xff] }
  0x33   :  { %268 = vst.msk [vmem:[%s1808_s4 + $0x160] sm:$0xff] %vm223_vm0, %v203_v54  ;;  %276 = vst.msk [vmem:[%s1808_s4 + $0x1a0] sm:$0xff] %vm223_vm0, %v211_v24  ;;  %v215_v40 = vadd.f32 %v768_v15, %v144_v37  ;;  %v146_v45 = vmul.f32 %v763_v14, %v75_v43  ;;  %v340_v49 = vld [vmem:[%s1804_s1 + $0x1a0] sm:$0xff]  ;;  %v78_v50 = vld [vmem:[%s1807_s0 + $0x1e8] sm:$0xff] }
  0x34   :  { %v206_v61 = vadd.f32 %v768_v15, %v135_v58  ;;  %278 = vst.msk [vmem:[%s1808_s4 + $0x1b0] sm:$0xff] %vm223_vm0, %v213_v32  ;;  %v77_v51 = vld [vmem:[%s1807_s0 + $0x1e0] sm:$0xff]  ;;  %v343_v54 = vld [vmem:[%s1804_s1 + $0x1b8] sm:$0xff]  ;;  %v342_v57 = vld [vmem:[%s1804_s1 + $0x1b0] sm:$0xff] }
  0x35   :  { %280 = vst.msk [vmem:[%s1808_s4 + $0x1c0] sm:$0xff] %vm223_vm0, %v215_v40  ;;  %v217_v48 = vadd.f32 %v768_v15, %v146_v45  ;;  %v148_v53 = vmul.f32 %v763_v14, %v77_v51  ;;  %v80_v58 = vld [vmem:[%s1807_s0 + $0x1f8] sm:$0xff]  ;;  %v79_v59 = vld [vmem:[%s1807_s0 + $0x1f0] sm:$0xff]  ;;  %v344_v1 = vld [vmem:[%s1804_s1 + $0x1c0] sm:$0xff] }
  0x36   :  { %470 = vrot.lane.b32.xlu1 %v315_v2, %s680_s19  ;;  %468 = vrot.lane.b32.xlu0 %v314_v5, %s680_s19  ;;  %271 = vst.msk [vmem:[%s1808_s4 + $0x178] sm:$0xff] %vm223_vm0, %v206_v61  ;;  %v137_v2 = vmul.f32 %v763_v14, %v66_v0  ;;  %v150_v61 = vmul.f32 %v763_v14, %v79_v59  ;;  %v345_v0 = vld [vmem:[%s1804_s1 + $0x1c8] sm:$0xff] }
  0x37   :  { %282 = vst.msk [vmem:[%s1808_s4 + $0x1d0] sm:$0xff] %vm223_vm0, %v217_v48  ;;  %v219_v56 = vadd.f32 %v768_v15, %v148_v53  ;;  %v350_v9 = vld [vmem:[%s1804_s1 + $0x1f0] sm:$0xff] }
  0x38   :  { %v208_v5 = vadd.f32 %v768_v15, %v137_v2 }
  0x39   :  { %284 = vst.msk [vmem:[%s1808_s4 + $0x1e0] sm:$0xff] %vm223_vm0, %v219_v56 }
  0x3a   :  { %474 = vrot.lane.b32.xlu1 %v317_v10, %s680_s19  ;;  %472 = vrot.lane.b32.xlu0 %v316_v13, %s680_s19  ;;  %273 = vst.msk [vmem:[%s1808_s4 + $0x188] sm:$0xff] %vm223_vm0, %v208_v5  ;;  %v139_v10 = vmul.f32 %v763_v14, %v68_v8  ;;  %v348_v5 = vld [vmem:[%s1804_s1 + $0x1e0] sm:$0xff] }
  0x3b   :  { %v351_v8 = vld [vmem:[%s1804_s1 + $0x1f8] sm:$0xff] }
  0x3c   :  { %v210_v13 = vadd.f32 %v768_v15, %v139_v10 }
  0x3e   :  { %478 = vrot.lane.b32.xlu1 %v319_v20, %s680_s19  ;;  %476 = vrot.lane.b32.xlu0 %v318_v23, %s680_s19  ;;  %275 = vst.msk [vmem:[%s1808_s4 + $0x198] sm:$0xff] %vm223_vm0, %v210_v13  ;;  %v141_v20 = vmul.f32 %v763_v14, %v70_v18 }
  0x40   :  { %v212_v23 = vadd.f32 %v768_v15, %v141_v20 }
  0x42   :  { %482 = vrot.lane.b32.xlu1 %v321_v28, %s680_s19  ;;  %480 = vrot.lane.b32.xlu0 %v320_v31, %s680_s19  ;;  %277 = vst.msk [vmem:[%s1808_s4 + $0x1a8] sm:$0xff] %vm223_vm0, %v212_v23  ;;  %v143_v28 = vmul.f32 %v763_v14, %v72_v26 }
  0x44   :  { %v214_v31 = vadd.f32 %v768_v15, %v143_v28 }
  0x46   :  { %486 = vrot.lane.b32.xlu1 %v323_v36, %s680_s19  ;;  %484 = vrot.lane.b32.xlu0 %v322_v39, %s680_s19  ;;  %279 = vst.msk [vmem:[%s1808_s4 + $0x1b8] sm:$0xff] %vm223_vm0, %v214_v31  ;;  %v145_v36 = vmul.f32 %v763_v14, %v74_v34 }
  0x48   :  { %v216_v39 = vadd.f32 %v768_v15, %v145_v36 }
  0x4a   :  { %490 = vrot.lane.b32.xlu1 %v325_v44, %s680_s19  ;;  %488 = vrot.lane.b32.xlu0 %v324_v47, %s680_s19  ;;  %281 = vst.msk [vmem:[%s1808_s4 + $0x1c8] sm:$0xff] %vm223_vm0, %v216_v39  ;;  %v147_v44 = vmul.f32 %v763_v14, %v76_v42 }
  0x4c   :  { %v218_v47 = vadd.f32 %v768_v15, %v147_v44 }
  0x4e   :  { %494 = vrot.lane.b32.xlu1 %v327_v52, %s680_s19  ;;  %492 = vrot.lane.b32.xlu0 %v326_v55, %s680_s19  ;;  %283 = vst.msk [vmem:[%s1808_s4 + $0x1d8] sm:$0xff] %vm223_vm0, %v218_v47  ;;  %v149_v52 = vmul.f32 %v763_v14, %v78_v50 }
  0x50   :  { %v220_v55 = vadd.f32 %v768_v15, %v149_v52 }
  0x52   :  { %498 = vrot.lane.b32.xlu1 %v329_v60, %s680_s19  ;;  %496 = vrot.lane.b32.xlu0 %v328_v63, %s680_s19  ;;  %285 = vst.msk [vmem:[%s1808_s4 + $0x1e8] sm:$0xff] %vm223_vm0, %v220_v55  ;;  %v151_v60 = vmul.f32 %v763_v14, %v80_v58  ;;  %v221_v63 = vadd.f32 %v768_v15, %v150_v61  ;;  %v347_v14 = vld [vmem:[%s1804_s1 + $0x1d8] sm:$0xff] }
  0x54   :  { %v222_v62 = vadd.f32 %v768_v15, %v151_v60  ;;  %286 = vst.msk [vmem:[%s1808_s4 + $0x1f0] sm:$0xff] %vm223_vm0, %v221_v63  ;;  %v346_v15 = vld [vmem:[%s1804_s1 + $0x1d0] sm:$0xff] }
  0x56   :  { %502 = vrot.lane.b32.xlu1 %v331_v4, %s680_s19  ;;  %500 = vrot.lane.b32.xlu0 %v330_v7, %s680_s19  ;;  %287 = vst.msk [vmem:[%s1808_s4 + $0x1f8] sm:$0xff] %vm223_vm0, %v222_v62  ;;  %v349_v4 = vld [vmem:[%s1804_s1 + $0x1e8] sm:$0xff] }
  0x5a   :  { %506 = vrot.lane.b32.xlu1 %v333_v12, %s680_s19  ;;  %504 = vrot.lane.b32.xlu0 %v332_v17, %s680_s19 }
  0x5e   :  { %510 = vrot.lane.b32.xlu1 %v335_v22, %s680_s19  ;;  %508 = vrot.lane.b32.xlu0 %v334_v25, %s680_s19 }
  0x62   :  { %514 = vrot.lane.b32.xlu1 %v337_v30, %s680_s19  ;;  %512 = vrot.lane.b32.xlu0 %v336_v33, %s680_s19 }
  0x66   :  { %518 = vrot.lane.b32.xlu1 %v339_v38, %s680_s19  ;;  %516 = vrot.lane.b32.xlu0 %v338_v41, %s680_s19 }
  0x6a   :  { %522 = vrot.lane.b32.xlu1 %v341_v46, %s680_s19  ;;  %520 = vrot.lane.b32.xlu0 %v340_v49, %s680_s19 }
  0x6e   :  { %526 = vrot.lane.b32.xlu1 %v343_v54, %s680_s19  ;;  %524 = vrot.lane.b32.xlu0 %v342_v57, %s680_s19 }
  0x72   :  { %530 = vrot.lane.b32.xlu1 %v345_v0, %s680_s19  ;;  %528 = vrot.lane.b32.xlu0 %v344_v1, %s680_s19 }
  0x74   :  { %v421_v2 = vpop.permute.xlu1 %420  ;;  %v417_v3 = vpop.permute.xlu0 %416 }
  0x75   :  { %611 = vst.msk [vmem:[%s1808_s4 + $0x10] sm:$0xff] %vm608_vm1, %v421_v2  ;;  %609 = vst.msk [vmem:[%s1808_s4] sm:$0xff] %vm608_vm1, %v417_v3 }
  0x76   :  { %534 = vrot.lane.b32.xlu1 %v347_v14, %s680_s19  ;;  %532 = vrot.lane.b32.xlu0 %v346_v15, %s680_s19 }
  0x78   :  { %v423_v6 = vpop.permute.xlu1 %422  ;;  %v419_v7 = vpop.permute.xlu0 %418 }
  0x79   :  { %612 = vst.msk [vmem:[%s1808_s4 + $0x18] sm:$0xff] %vm608_vm1, %v423_v6  ;;  %610 = vst.msk [vmem:[%s1808_s4 + $0x8] sm:$0xff] %vm608_vm1, %v419_v7 }
  0x7a   :  { %538 = vrot.lane.b32.xlu1 %v349_v4, %s680_s19  ;;  %536 = vrot.lane.b32.xlu0 %v348_v5, %s680_s19 }
  0x7c   :  { %v427_v10 = vpop.permute.xlu1 %426  ;;  %v425_v11 = vpop.permute.xlu0 %424 }
  0x7d   :  { %614 = vst.msk [vmem:[%s1808_s4 + $0x28] sm:$0xff] %vm608_vm1, %v427_v10  ;;  %613 = vst.msk [vmem:[%s1808_s4 + $0x20] sm:$0xff] %vm608_vm1, %v425_v11 }
  0x7e   :  { %542 = vrot.lane.b32.xlu1 %v351_v8, %s680_s19  ;;  %540 = vrot.lane.b32.xlu0 %v350_v9, %s680_s19 }
  0x80   :  { %v431_v12 = vpop.permute.xlu1 %430  ;;  %v429_v13 = vpop.permute.xlu0 %428 }
  0x81   :  { %616 = vst.msk [vmem:[%s1808_s4 + $0x38] sm:$0xff] %vm608_vm1, %v431_v12  ;;  %615 = vst.msk [vmem:[%s1808_s4 + $0x30] sm:$0xff] %vm608_vm1, %v429_v13 }
  0x84   :  { %v435_v16 = vpop.permute.xlu1 %434  ;;  %v433_v17 = vpop.permute.xlu0 %432 }
  0x85   :  { %618 = vst.msk [vmem:[%s1808_s4 + $0x48] sm:$0xff] %vm608_vm1, %v435_v16  ;;  %617 = vst.msk [vmem:[%s1808_s4 + $0x40] sm:$0xff] %vm608_vm1, %v433_v17 }
  0x88   :  { %v439_v18 = vpop.permute.xlu1 %438  ;;  %v437_v19 = vpop.permute.xlu0 %436 }
  0x89   :  { %620 = vst.msk [vmem:[%s1808_s4 + $0x58] sm:$0xff] %vm608_vm1, %v439_v18  ;;  %619 = vst.msk [vmem:[%s1808_s4 + $0x50] sm:$0xff] %vm608_vm1, %v437_v19 }
  0x8c   :  { %v443_v20 = vpop.permute.xlu1 %442  ;;  %v441_v21 = vpop.permute.xlu0 %440 }
  0x8d   :  { %622 = vst.msk [vmem:[%s1808_s4 + $0x68] sm:$0xff] %vm608_vm1, %v443_v20  ;;  %621 = vst.msk [vmem:[%s1808_s4 + $0x60] sm:$0xff] %vm608_vm1, %v441_v21 }
  0x90   :  { %v447_v22 = vpop.permute.xlu1 %446  ;;  %v445_v23 = vpop.permute.xlu0 %444 }
  0x91   :  { %624 = vst.msk [vmem:[%s1808_s4 + $0x78] sm:$0xff] %vm608_vm1, %v447_v22  ;;  %623 = vst.msk [vmem:[%s1808_s4 + $0x70] sm:$0xff] %vm608_vm1, %v445_v23 }
  0x94   :  { %v451_v24 = vpop.permute.xlu1 %450  ;;  %v449_v25 = vpop.permute.xlu0 %448 }
  0x95   :  { %626 = vst.msk [vmem:[%s1808_s4 + $0x88] sm:$0xff] %vm608_vm1, %v451_v24  ;;  %625 = vst.msk [vmem:[%s1808_s4 + $0x80] sm:$0xff] %vm608_vm1, %v449_v25 }
  0x98   :  { %v455_v26 = vpop.permute.xlu1 %454  ;;  %v453_v27 = vpop.permute.xlu0 %452 }
  0x99   :  { %628 = vst.msk [vmem:[%s1808_s4 + $0x98] sm:$0xff] %vm608_vm1, %v455_v26  ;;  %627 = vst.msk [vmem:[%s1808_s4 + $0x90] sm:$0xff] %vm608_vm1, %v453_v27 }
  0x9c   :  { %v459_v28 = vpop.permute.xlu1 %458  ;;  %v457_v29 = vpop.permute.xlu0 %456 }
  0x9d   :  { %630 = vst.msk [vmem:[%s1808_s4 + $0xa8] sm:$0xff] %vm608_vm1, %v459_v28  ;;  %629 = vst.msk [vmem:[%s1808_s4 + $0xa0] sm:$0xff] %vm608_vm1, %v457_v29 }
  0xa0   :  { %v463_v30 = vpop.permute.xlu1 %462  ;;  %v461_v31 = vpop.permute.xlu0 %460 }
  0xa1   :  { %632 = vst.msk [vmem:[%s1808_s4 + $0xb8] sm:$0xff] %vm608_vm1, %v463_v30  ;;  %631 = vst.msk [vmem:[%s1808_s4 + $0xb0] sm:$0xff] %vm608_vm1, %v461_v31 }
  0xa4   :  { %v467_v32 = vpop.permute.xlu1 %466  ;;  %v465_v33 = vpop.permute.xlu0 %464 }
  0xa5   :  { %634 = vst.msk [vmem:[%s1808_s4 + $0xc8] sm:$0xff] %vm608_vm1, %v467_v32  ;;  %633 = vst.msk [vmem:[%s1808_s4 + $0xc0] sm:$0xff] %vm608_vm1, %v465_v33 }
  0xa8   :  { %v471_v34 = vpop.permute.xlu1 %470  ;;  %v469_v35 = vpop.permute.xlu0 %468 }
  0xa9   :  { %636 = vst.msk [vmem:[%s1808_s4 + $0xd8] sm:$0xff] %vm608_vm1, %v471_v34  ;;  %635 = vst.msk [vmem:[%s1808_s4 + $0xd0] sm:$0xff] %vm608_vm1, %v469_v35 }
  0xac   :  { %v475_v36 = vpop.permute.xlu1 %474  ;;  %v473_v37 = vpop.permute.xlu0 %472 }
  0xad   :  { %638 = vst.msk [vmem:[%s1808_s4 + $0xe8] sm:$0xff] %vm608_vm1, %v475_v36  ;;  %637 = vst.msk [vmem:[%s1808_s4 + $0xe0] sm:$0xff] %vm608_vm1, %v473_v37 }
  0xb0   :  { %v479_v38 = vpop.permute.xlu1 %478  ;;  %v477_v39 = vpop.permute.xlu0 %476 }
  0xb1   :  { %640 = vst.msk [vmem:[%s1808_s4 + $0xf8] sm:$0xff] %vm608_vm1, %v479_v38  ;;  %639 = vst.msk [vmem:[%s1808_s4 + $0xf0] sm:$0xff] %vm608_vm1, %v477_v39 }
  0xb4   :  { %v483_v40 = vpop.permute.xlu1 %482  ;;  %v481_v41 = vpop.permute.xlu0 %480 }
  0xb5   :  { %642 = vst.msk [vmem:[%s1808_s4 + $0x108] sm:$0xff] %vm608_vm1, %v483_v40  ;;  %641 = vst.msk [vmem:[%s1808_s4 + $0x100] sm:$0xff] %vm608_vm1, %v481_v41 }
  0xb8   :  { %v487_v42 = vpop.permute.xlu1 %486  ;;  %v485_v43 = vpop.permute.xlu0 %484 }
  0xb9   :  { %644 = vst.msk [vmem:[%s1808_s4 + $0x118] sm:$0xff] %vm608_vm1, %v487_v42  ;;  %643 = vst.msk [vmem:[%s1808_s4 + $0x110] sm:$0xff] %vm608_vm1, %v485_v43 }
  0xbc   :  { %v491_v44 = vpop.permute.xlu1 %490  ;;  %v489_v45 = vpop.permute.xlu0 %488 }
  0xbd   :  { %646 = vst.msk [vmem:[%s1808_s4 + $0x128] sm:$0xff] %vm608_vm1, %v491_v44  ;;  %645 = vst.msk [vmem:[%s1808_s4 + $0x120] sm:$0xff] %vm608_vm1, %v489_v45 }
  0xc0   :  { %v495_v46 = vpop.permute.xlu1 %494  ;;  %v493_v47 = vpop.permute.xlu0 %492 }
  0xc1   :  { %648 = vst.msk [vmem:[%s1808_s4 + $0x138] sm:$0xff] %vm608_vm1, %v495_v46  ;;  %647 = vst.msk [vmem:[%s1808_s4 + $0x130] sm:$0xff] %vm608_vm1, %v493_v47 }
  0xc4   :  { %v499_v48 = vpop.permute.xlu1 %498  ;;  %v497_v49 = vpop.permute.xlu0 %496 }
  0xc5   :  { %650 = vst.msk [vmem:[%s1808_s4 + $0x148] sm:$0xff] %vm608_vm1, %v499_v48  ;;  %649 = vst.msk [vmem:[%s1808_s4 + $0x140] sm:$0xff] %vm608_vm1, %v497_v49 }
  0xc8   :  { %v503_v50 = vpop.permute.xlu1 %502  ;;  %v501_v51 = vpop.permute.xlu0 %500 }
  0xc9   :  { %652 = vst.msk [vmem:[%s1808_s4 + $0x158] sm:$0xff] %vm608_vm1, %v503_v50  ;;  %651 = vst.msk [vmem:[%s1808_s4 + $0x150] sm:$0xff] %vm608_vm1, %v501_v51 }
  0xcc   :  { %v507_v52 = vpop.permute.xlu1 %506  ;;  %v505_v53 = vpop.permute.xlu0 %504 }
  0xcd   :  { %654 = vst.msk [vmem:[%s1808_s4 + $0x168] sm:$0xff] %vm608_vm1, %v507_v52  ;;  %653 = vst.msk [vmem:[%s1808_s4 + $0x160] sm:$0xff] %vm608_vm1, %v505_v53 }
  0xd0   :  { %v511_v54 = vpop.permute.xlu1 %510  ;;  %v509_v55 = vpop.permute.xlu0 %508 }
  0xd1   :  { %656 = vst.msk [vmem:[%s1808_s4 + $0x178] sm:$0xff] %vm608_vm1, %v511_v54  ;;  %655 = vst.msk [vmem:[%s1808_s4 + $0x170] sm:$0xff] %vm608_vm1, %v509_v55 }
  0xd4   :  { %v515_v56 = vpop.permute.xlu1 %514  ;;  %v513_v57 = vpop.permute.xlu0 %512 }
  0xd5   :  { %658 = vst.msk [vmem:[%s1808_s4 + $0x188] sm:$0xff] %vm608_vm1, %v515_v56  ;;  %657 = vst.msk [vmem:[%s1808_s4 + $0x180] sm:$0xff] %vm608_vm1, %v513_v57 }
  0xd8   :  { %v519_v58 = vpop.permute.xlu1 %518  ;;  %v517_v59 = vpop.permute.xlu0 %516 }
  0xd9   :  { %660 = vst.msk [vmem:[%s1808_s4 + $0x198] sm:$0xff] %vm608_vm1, %v519_v58  ;;  %659 = vst.msk [vmem:[%s1808_s4 + $0x190] sm:$0xff] %vm608_vm1, %v517_v59 }
  0xdc   :  { %v523_v60 = vpop.permute.xlu1 %522  ;;  %v521_v61 = vpop.permute.xlu0 %520 }
  0xdd   :  { %662 = vst.msk [vmem:[%s1808_s4 + $0x1a8] sm:$0xff] %vm608_vm1, %v523_v60  ;;  %661 = vst.msk [vmem:[%s1808_s4 + $0x1a0] sm:$0xff] %vm608_vm1, %v521_v61 }
  0xe0   :  { %v527_v62 = vpop.permute.xlu1 %526  ;;  %v525_v63 = vpop.permute.xlu0 %524 }
  0xe1   :  { %664 = vst.msk [vmem:[%s1808_s4 + $0x1b8] sm:$0xff] %vm608_vm1, %v527_v62  ;;  %663 = vst.msk [vmem:[%s1808_s4 + $0x1b0] sm:$0xff] %vm608_vm1, %v525_v63 }
  0xe4   :  { %v531_v0 = vpop.permute.xlu1 %530  ;;  %v529_v1 = vpop.permute.xlu0 %528 }
  0xe5   :  { %666 = vst.msk [vmem:[%s1808_s4 + $0x1c8] sm:$0xff] %vm608_vm1, %v531_v0  ;;  %665 = vst.msk [vmem:[%s1808_s4 + $0x1c0] sm:$0xff] %vm608_vm1, %v529_v1 }
  0xe8   :  { %v535_v14 = vpop.permute.xlu1 %534  ;;  %v533_v15 = vpop.permute.xlu0 %532 }
  0xe9   :  { %668 = vst.msk [vmem:[%s1808_s4 + $0x1d8] sm:$0xff] %vm608_vm1, %v535_v14  ;;  %667 = vst.msk [vmem:[%s1808_s4 + $0x1d0] sm:$0xff] %vm608_vm1, %v533_v15 }
  0xec   :  { %v539_v2 = vpop.permute.xlu1 %538  ;;  %v537_v3 = vpop.permute.xlu0 %536 }
  0xed   :  { %670 = vst.msk [vmem:[%s1808_s4 + $0x1e8] sm:$0xff] %vm608_vm1, %v539_v2  ;;  %669 = vst.msk [vmem:[%s1808_s4 + $0x1e0] sm:$0xff] %vm608_vm1, %v537_v3 }
  0xf0   :  { %v543_v4 = vpop.permute.xlu1 %542  ;;  %v541_v5 = vpop.permute.xlu0 %540 }
  0xf1   :  { %672 = vst.msk [vmem:[%s1808_s4 + $0x1f8] sm:$0xff] %vm608_vm1, %v543_v4  ;;  %671 = vst.msk [vmem:[%s1808_s4 + $0x1f0] sm:$0xff] %vm608_vm1, %v541_v5 }

</bundles_post_ra>
